<compile_context>
chip_gen: v5e
topology: v5e:2x2
jax: 0.10.0
libtpu: 0.0.40
codegen_flags: <defaults>
</compile_context>

<pallas_src>
import jax
import jax.numpy as jnp
from jax.experimental import pallas as pl
from jax.experimental.pallas import tpu as pltpu

# ---------------- config (small shapes consistent with the module) -----------
B, C, H, W = 2, 4, 16, 16        # img: (B, C, H, W)
T = 8                            # caption length
T1 = T + 1                       # sequence length fed to the RNN
EMBED = 32                       # embedding_size
HIDDEN = 32                      # hidden_size
NO_LAYERS = 2                    # no_layers
VOCAB = 64                       # vocab_size
FC_IN = 2048                     # resnet50 fc.in_features
OUT_PAD = 128                    # decoder output padded to a full lane width


# ---------------- fused forward kernel ----------------------------------------
def fused_forward_kernel(img_ref, cap_ref, bb_w_ref, bb_b_ref,
                         lin_w_hbm, lin_b_ref, emb_ref, *rest):
    # rest = [wih_0, whh_0, b_0, ..., wih_{L-1}, whh_{L-1}, b_{L-1},
    #         dec_w, dec_b, out_ref, lin_w_vmem, lin_w_sem]
    rnn_refs = rest[:3 * NO_LAYERS]
    dec_w_ref, dec_b_ref, out_ref, lin_w_vmem, lin_w_sem = rest[3 * NO_LAYERS:]
    f32 = jnp.float32

    # Kick off the 256 KB lin_w HBM->VMEM copy immediately; it is hidden behind
    # the GAP / backbone matmul / one-hot / embedding / token-projection work.
    lin_w_cp = pltpu.make_async_copy(lin_w_hbm, lin_w_vmem, lin_w_sem.at[0])
    lin_w_cp.start()

    # ---- frozen backbone stand-in: global average pool fused in-kernel ------
    feat = jnp.mean(img_ref[...], axis=-1)                                  # (B, C)
    feat = jnp.dot(feat, bb_w_ref[...], preferred_element_type=f32) + bb_b_ref[...]
    feat = jnp.maximum(feat, 0.0)                                           # (B, FC_IN)

    # ---- self.embed : one-hot @ table on the MXU (no gather) ----------------
    # cap_ref is (T*B, 1) int32 in time-major token order (row t*B + b).
    onehot = (jax.lax.broadcasted_iota(jnp.int32, (T * B, VOCAB), 1)
              == cap_ref[...]).astype(f32)                                  # (T*B, V)
    emb = jnp.dot(onehot, emb_ref[...], preferred_element_type=f32)         # (T*B, E)

    # ---- self.rnn : nn.RNN(E, H, NO_LAYERS, nonlinearity='relu') ------------
    wih = [rnn_refs[3 * l + 0][...] for l in range(NO_LAYERS)]
    whh = [rnn_refs[3 * l + 1][...] for l in range(NO_LAYERS)]
    bias = [rnn_refs[3 * l + 2][...] for l in range(NO_LAYERS)]   # (1, H), b_ih+b_hh

    # Layer-0 input projection hoisted off the serial chain, bias folded in.
    xin_tok = jnp.dot(emb, wih[0], preferred_element_type=f32) + bias[0]    # (T*B, H)

    # ---- self.linear : fc_in_features -> embedding_size ---------------------
    lin_w_cp.wait()                                                         # DMA now hidden
    y = jnp.dot(feat, lin_w_vmem[...], preferred_element_type=f32) + lin_b_ref[...]  # (B, E)
    xin_img = jnp.dot(y, wih[0], preferred_element_type=f32) + bias[0]      # (B, H)   t == 0

    h = [jnp.zeros((B, HIDDEN), f32) for _ in range(NO_LAYERS)]             # default h0 = 0
    hist = []                                   # top-layer states, value-resident (vregs)
    for t in range(T1):                         # static trip count -> fully unrolled
        x_t = xin_img if t == 0 else xin_tok[(t - 1) * B:t * B, :]          # (B, H)
        h[0] = jnp.maximum(
            x_t + jnp.dot(h[0], whh[0], preferred_element_type=f32), 0.0)
        for l in range(1, NO_LAYERS):
            h[l] = jnp.maximum(
                jnp.dot(h[l - 1], wih[l], preferred_element_type=f32)
                + jnp.dot(h[l], whh[l], preferred_element_type=f32) + bias[l], 0.0)
        hist.append(h[NO_LAYERS - 1])

    # Batch-major (row b*T1 + t) ordering as a compile-time permutation — no
    # scratch writes, no readback, no transpose anywhere.
    hid = jnp.concatenate(
        [hist[t][b:b + 1, :] for b in range(B) for t in range(T1)], axis=0)  # (B*T1, H)

    # ---- self.linearDec : one flattened (B*T1, H) @ (H, 128) matmul ---------
    # dec_w/dec_b are zero-padded to 128 lanes -> unmasked, lane-dense store.
    out_ref[...] = (jnp.dot(hid, dec_w_ref[...], preferred_element_type=f32)
                    + dec_b_ref[...])                                       # (B*T1, 128)


# ---------------- wrapper ------------------------------------------------------
def forward(params, img, cap):
    # Wrapper-side ops are free (row-major reshapes / tiny slices) or negligible
    # (64-byte transpose of the caption ids into time-major order).
    img_r = img.reshape(B, C, H * W)
    cap_tm = cap.astype(jnp.int32).T.reshape(T * B, 1)   # row t*B + b = cap[b, t]

    rnn_flat = []
    for layer in params["rnn"]:
        rnn_flat += [layer["wih"], layer["whh"], layer["b"]]

    n_in = 7 + 3 * NO_LAYERS + 2
    in_specs = [pl.BlockSpec(memory_space=pltpu.MemorySpace.VMEM)] * n_in
    in_specs[4] = pl.BlockSpec(memory_space=pl.ANY)      # lin_w stays in HBM; DMA'd in-kernel

    out2d = pl.pallas_call(
        fused_forward_kernel,
        out_shape=jax.ShapeDtypeStruct((B * T1, OUT_PAD), jnp.float32),
        in_specs=in_specs,
        out_specs=pl.BlockSpec(memory_space=pltpu.MemorySpace.VMEM),
        scratch_shapes=[pltpu.VMEM((FC_IN, EMBED), jnp.float32),   # lin_w landing buffer
                        pltpu.SemaphoreType.DMA((1,))],
    )(img_r, cap_tm,
      params["backbone_w"], params["backbone_b"],
      params["lin_w"], params["lin_b"],
      params["emb"],
      *rnn_flat,
      params["dec_w_pad"], params["dec_b_pad"])

    # Rows are already batch-major (b*T1 + t): slice off the lane padding and reshape.
    return out2d[:, :VOCAB].reshape(B, T1, VOCAB)


# ---------------- deterministic parameter init ---------------------------------
def init_params(key):
    ks = jax.random.split(key, 8 + NO_LAYERS)
    s_h = 1.0 / jnp.sqrt(float(HIDDEN))
    p = {}
    # TODO(synk): stand-in for the frozen pretrained ResNet50 backbone.
    p["backbone_w"] = jax.random.normal(ks[0], (C, FC_IN), jnp.float32) * 0.1
    p["backbone_b"] = jnp.zeros((1, FC_IN), jnp.float32)
    # self.linear : fc_in_features -> embedding_size
    p["lin_w"] = jax.random.normal(ks[1], (FC_IN, EMBED), jnp.float32) / jnp.sqrt(float(FC_IN))
    p["lin_b"] = jnp.zeros((1, EMBED), jnp.float32)
    # self.embed : Embedding(vocab_size, embedding_size)
    p["emb"] = jax.random.normal(ks[2], (VOCAB, EMBED), jnp.float32) * 0.1
    # self.rnn : nn.RNN(embedding_size, hidden_size, no_layers, relu)
    rnn = []
    for l in range(NO_LAYERS):
        in_size = EMBED if l == 0 else HIDDEN
        k1, k2, k3, k4 = jax.random.split(ks[3 + l], 4)
        rnn.append(dict(
            wih=jax.random.uniform(k1, (in_size, HIDDEN), jnp.float32, -s_h, s_h),
            whh=jax.random.uniform(k2, (HIDDEN, HIDDEN), jnp.float32, -s_h, s_h),
            # b_ih + b_hh folded (they are always summed in nn.RNN)
            b=(jax.random.uniform(k3, (1, HIDDEN), jnp.float32, -s_h, s_h)
               + jax.random.uniform(k4, (1, HIDDEN), jnp.float32, -s_h, s_h)),
        ))
    p["rnn"] = rnn
    # self.linearDec : hidden_size -> vocab_size (zero-padded to 128 lanes so the
    # kernel's only real output store is unmasked / lane-dense).
    dec_w = jax.random.uniform(ks[3 + NO_LAYERS], (HIDDEN, VOCAB), jnp.float32, -s_h, s_h)
    dec_b = jax.random.uniform(ks[4 + NO_LAYERS], (1, VOCAB), jnp.float32, -s_h, s_h)
    p["dec_w_pad"] = jnp.pad(dec_w, ((0, 0), (0, OUT_PAD - VOCAB)))
    p["dec_b_pad"] = jnp.pad(dec_b, ((0, 0), (0, OUT_PAD - VOCAB)))
    return p


if __name__ == "__main__":
    key = jax.random.PRNGKey(0)
    k_img, k_cap, k_par = jax.random.split(key, 3)
    img = jax.random.normal(k_img, (B, C, H, W), jnp.float32)
    cap = jax.random.randint(k_cap, (B, T), 0, VOCAB, jnp.int32)
    params = init_params(k_par)

    out = jax.jit(forward)(params, img, cap)
    out = jax.block_until_ready(out)
    assert out.shape == (B, T + 1, VOCAB) and out.dtype == jnp.float32
    print("KERNEL_OK")
</pallas_src>

<mosaic_0001>
module attributes {stable_mosaic.version = 11 : i64} {
  func.func @fused_forward_kernel(%arg0: memref<2x4x256xf32, #tpu.memory_space<vmem>>, %arg1: memref<16x1xi32, #tpu.memory_space<vmem>>, %arg2: memref<4x2048xf32, #tpu.memory_space<vmem>>, %arg3: memref<1x2048xf32, #tpu.memory_space<vmem>>, %arg4: memref<2048x32xf32, #tpu.memory_space<any>>, %arg5: memref<1x32xf32, #tpu.memory_space<vmem>>, %arg6: memref<64x32xf32, #tpu.memory_space<vmem>>, %arg7: memref<32x32xf32, #tpu.memory_space<vmem>>, %arg8: memref<32x32xf32, #tpu.memory_space<vmem>>, %arg9: memref<1x32xf32, #tpu.memory_space<vmem>>, %arg10: memref<32x32xf32, #tpu.memory_space<vmem>>, %arg11: memref<32x32xf32, #tpu.memory_space<vmem>>, %arg12: memref<1x32xf32, #tpu.memory_space<vmem>>, %arg13: memref<32x128xf32, #tpu.memory_space<vmem>>, %arg14: memref<1x128xf32, #tpu.memory_space<vmem>>, %arg15: memref<18x128xf32, #tpu.memory_space<vmem>>, %arg16: memref<2048x32xf32, #tpu.memory_space<vmem>>, %arg17: memref<1x!tpu.dma_semaphore, #tpu.memory_space<semaphore_mem>>) attributes {dimension_semantics = [], scalar_prefetch = 0 : i64, scratch_operands = 2 : i64, tpu.core_type = #tpu.core_type<tc>} {
    %c0_i32 = arith.constant 0 : i32
    %0 = tpu.memref_slice %arg17[%c0_i32] : memref<1x!tpu.dma_semaphore, #tpu.memory_space<semaphore_mem>> -> memref<1x!tpu.dma_semaphore, #tpu.memory_space<semaphore_mem>>
    %1 = tpu.memref_squeeze %0 : memref<1x!tpu.dma_semaphore, #tpu.memory_space<semaphore_mem>> -> memref<!tpu.dma_semaphore, #tpu.memory_space<semaphore_mem>>
    tpu.enqueue_dma source(%arg4 : memref<2048x32xf32, #tpu.memory_space<any>>) target(%arg16 : memref<2048x32xf32, #tpu.memory_space<vmem>>) target_semaphore(%1 : memref<!tpu.dma_semaphore, #tpu.memory_space<semaphore_mem>>)
    %c0 = arith.constant 0 : index
    %c0_0 = arith.constant 0 : index
    %c0_1 = arith.constant 0 : index
    %2 = vector.load %arg0[%c0, %c0_0, %c0_1] : memref<2x4x256xf32, #tpu.memory_space<vmem>>, vector<2x4x256xf32>
    %cst = arith.constant dense<0.000000e+00> : vector<2x4xf32>
    %3 = vector.multi_reduction <add>, %2, %cst [2] : vector<2x4x256xf32> to vector<2x4xf32>
    %cst_2 = arith.constant 2.560000e+02 : f32
    %4 = vector.broadcast %cst_2 : f32 to vector<2x4xf32>
    %5 = arith.divf %3, %4 : vector<2x4xf32>
    %c0_3 = arith.constant 0 : index
    %c0_4 = arith.constant 0 : index
    %6 = vector.load %arg2[%c0_3, %c0_4] : memref<4x2048xf32, #tpu.memory_space<vmem>>, vector<4x2048xf32>
    %cst_5 = arith.constant dense<0.000000e+00> : vector<2x2048xf32>
    %7 = tpu.matmul %5, %6, %cst_5 {dimension_numbers = #tpu.dot_dimension_numbers<[1], [0], [0], [1], [0, 0, 1, 1], [], []>} : vector<2x4xf32>, vector<4x2048xf32>, vector<2x2048xf32> -> vector<2x2048xf32>
    %c0_6 = arith.constant 0 : index
    %c0_7 = arith.constant 0 : index
    %8 = vector.load %arg3[%c0_6, %c0_7] : memref<1x2048xf32, #tpu.memory_space<vmem>>, vector<1x2048xf32>
    %9 = vector.broadcast %8 : vector<1x2048xf32> to vector<2x2048xf32>
    %10 = arith.addf %7, %9 : vector<2x2048xf32>
    %cst_8 = arith.constant 0.000000e+00 : f32
    %11 = vector.broadcast %cst_8 : f32 to vector<2x2048xf32>
    %12 = arith.maximumf %10, %11 : vector<2x2048xf32>
    %13 = tpu.iota {dimensions = array<i32: 1>} : vector<16x64xi32>
    %c0_9 = arith.constant 0 : index
    %c0_10 = arith.constant 0 : index
    %14 = vector.load %arg1[%c0_9, %c0_10] : memref<16x1xi32, #tpu.memory_space<vmem>>, vector<16x1xi32>
    %15 = vector.broadcast %14 : vector<16x1xi32> to vector<16x64xi32>
    %16 = arith.cmpi eq, %13, %15 : vector<16x64xi32>
    %17 = arith.extui %16 : vector<16x64xi1> to vector<16x64xi32>
    %18 = arith.sitofp %17 : vector<16x64xi32> to vector<16x64xf32>
    %c0_11 = arith.constant 0 : index
    %c0_12 = arith.constant 0 : index
    %19 = vector.load %arg6[%c0_11, %c0_12] : memref<64x32xf32, #tpu.memory_space<vmem>>, vector<64x32xf32>
    %cst_13 = arith.constant dense<0.000000e+00> : vector<16x32xf32>
    %20 = tpu.matmul %18, %19, %cst_13 {dimension_numbers = #tpu.dot_dimension_numbers<[1], [0], [0], [1], [0, 0, 1, 1], [], []>} : vector<16x64xf32>, vector<64x32xf32>, vector<16x32xf32> -> vector<16x32xf32>
    %c0_14 = arith.constant 0 : index
    %c0_15 = arith.constant 0 : index
    %21 = vector.load %arg7[%c0_14, %c0_15] : memref<32x32xf32, #tpu.memory_space<vmem>>, vector<32x32xf32>
    %c0_16 = arith.constant 0 : index
    %c0_17 = arith.constant 0 : index
    %22 = vector.load %arg10[%c0_16, %c0_17] : memref<32x32xf32, #tpu.memory_space<vmem>>, vector<32x32xf32>
    %c0_18 = arith.constant 0 : index
    %c0_19 = arith.constant 0 : index
    %23 = vector.load %arg8[%c0_18, %c0_19] : memref<32x32xf32, #tpu.memory_space<vmem>>, vector<32x32xf32>
    %c0_20 = arith.constant 0 : index
    %c0_21 = arith.constant 0 : index
    %24 = vector.load %arg11[%c0_20, %c0_21] : memref<32x32xf32, #tpu.memory_space<vmem>>, vector<32x32xf32>
    %c0_22 = arith.constant 0 : index
    %c0_23 = arith.constant 0 : index
    %25 = vector.load %arg9[%c0_22, %c0_23] : memref<1x32xf32, #tpu.memory_space<vmem>>, vector<1x32xf32>
    %c0_24 = arith.constant 0 : index
    %c0_25 = arith.constant 0 : index
    %26 = vector.load %arg12[%c0_24, %c0_25] : memref<1x32xf32, #tpu.memory_space<vmem>>, vector<1x32xf32>
    %cst_26 = arith.constant dense<0.000000e+00> : vector<16x32xf32>
    %27 = tpu.matmul %20, %21, %cst_26 {dimension_numbers = #tpu.dot_dimension_numbers<[1], [0], [0], [1], [0, 0, 1, 1], [], []>} : vector<16x32xf32>, vector<32x32xf32>, vector<16x32xf32> -> vector<16x32xf32>
    %28 = vector.broadcast %25 : vector<1x32xf32> to vector<16x32xf32>
    %29 = arith.addf %27, %28 : vector<16x32xf32>
    %c0_i32_27 = arith.constant 0 : i32
    %30 = tpu.memref_slice %arg17[%c0_i32_27] : memref<1x!tpu.dma_semaphore, #tpu.memory_space<semaphore_mem>> -> memref<1x!tpu.dma_semaphore, #tpu.memory_space<semaphore_mem>>
    %31 = tpu.memref_squeeze %30 : memref<1x!tpu.dma_semaphore, #tpu.memory_space<semaphore_mem>> -> memref<!tpu.dma_semaphore, #tpu.memory_space<semaphore_mem>>
    tpu.wait_dma2 semaphore(%31 : memref<!tpu.dma_semaphore, #tpu.memory_space<semaphore_mem>>) src(%arg4 : memref<2048x32xf32, #tpu.memory_space<any>>) dst(%arg16 : memref<2048x32xf32, #tpu.memory_space<vmem>>)
    %c0_28 = arith.constant 0 : index
    %c0_29 = arith.constant 0 : index
    %32 = vector.load %arg16[%c0_28, %c0_29] : memref<2048x32xf32, #tpu.memory_space<vmem>>, vector<2048x32xf32>
    %cst_30 = arith.constant dense<0.000000e+00> : vector<2x32xf32>
    %33 = tpu.matmul %12, %32, %cst_30 {dimension_numbers = #tpu.dot_dimension_numbers<[1], [0], [0], [1], [0, 0, 1, 1], [], []>} : vector<2x2048xf32>, vector<2048x32xf32>, vector<2x32xf32> -> vector<2x32xf32>
    %c0_31 = arith.constant 0 : index
    %c0_32 = arith.constant 0 : index
    %34 = vector.load %arg5[%c0_31, %c0_32] : memref<1x32xf32, #tpu.memory_space<vmem>>, vector<1x32xf32>
    %35 = vector.broadcast %34 : vector<1x32xf32> to vector<2x32xf32>
    %36 = arith.addf %33, %35 : vector<2x32xf32>
    %cst_33 = arith.constant dense<0.000000e+00> : vector<2x32xf32>
    %37 = tpu.matmul %36, %21, %cst_33 {dimension_numbers = #tpu.dot_dimension_numbers<[1], [0], [0], [1], [0, 0, 1, 1], [], []>} : vector<2x32xf32>, vector<32x32xf32>, vector<2x32xf32> -> vector<2x32xf32>
    %38 = vector.broadcast %25 : vector<1x32xf32> to vector<2x32xf32>
    %39 = arith.addf %37, %38 : vector<2x32xf32>
    %cst_34 = arith.constant 0.000000e+00 : f32
    %40 = vector.broadcast %cst_34 : f32 to vector<2x32xf32>
    %cst_35 = arith.constant 0.000000e+00 : f32
    %41 = vector.broadcast %cst_35 : f32 to vector<2x32xf32>
    %cst_36 = arith.constant dense<0.000000e+00> : vector<2x32xf32>
    %42 = tpu.matmul %40, %23, %cst_36 {dimension_numbers = #tpu.dot_dimension_numbers<[1], [0], [0], [1], [0, 0, 1, 1], [], []>} : vector<2x32xf32>, vector<32x32xf32>, vector<2x32xf32> -> vector<2x32xf32>
    %43 = arith.addf %39, %42 : vector<2x32xf32>
    %cst_37 = arith.constant 0.000000e+00 : f32
    %44 = vector.broadcast %cst_37 : f32 to vector<2x32xf32>
    %45 = arith.maximumf %43, %44 : vector<2x32xf32>
    %cst_38 = arith.constant dense<0.000000e+00> : vector<2x32xf32>
    %46 = tpu.matmul %45, %22, %cst_38 {dimension_numbers = #tpu.dot_dimension_numbers<[1], [0], [0], [1], [0, 0, 1, 1], [], []>} : vector<2x32xf32>, vector<32x32xf32>, vector<2x32xf32> -> vector<2x32xf32>
    %cst_39 = arith.constant dense<0.000000e+00> : vector<2x32xf32>
    %47 = tpu.matmul %41, %24, %cst_39 {dimension_numbers = #tpu.dot_dimension_numbers<[1], [0], [0], [1], [0, 0, 1, 1], [], []>} : vector<2x32xf32>, vector<32x32xf32>, vector<2x32xf32> -> vector<2x32xf32>
    %48 = arith.addf %46, %47 : vector<2x32xf32>
    %49 = vector.broadcast %26 : vector<1x32xf32> to vector<2x32xf32>
    %50 = arith.addf %48, %49 : vector<2x32xf32>
    %cst_40 = arith.constant 0.000000e+00 : f32
    %51 = vector.broadcast %cst_40 : f32 to vector<2x32xf32>
    %52 = arith.maximumf %50, %51 : vector<2x32xf32>
    %53 = vector.extract_strided_slice %29 {offsets = [0, 0], sizes = [2, 32], strides = [1, 1]} : vector<16x32xf32> to vector<2x32xf32>
    %cst_41 = arith.constant dense<0.000000e+00> : vector<2x32xf32>
    %54 = tpu.matmul %45, %23, %cst_41 {dimension_numbers = #tpu.dot_dimension_numbers<[1], [0], [0], [1], [0, 0, 1, 1], [], []>} : vector<2x32xf32>, vector<32x32xf32>, vector<2x32xf32> -> vector<2x32xf32>
    %55 = arith.addf %53, %54 : vector<2x32xf32>
    %cst_42 = arith.constant 0.000000e+00 : f32
    %56 = vector.broadcast %cst_42 : f32 to vector<2x32xf32>
    %57 = arith.maximumf %55, %56 : vector<2x32xf32>
    %cst_43 = arith.constant dense<0.000000e+00> : vector<2x32xf32>
    %58 = tpu.matmul %57, %22, %cst_43 {dimension_numbers = #tpu.dot_dimension_numbers<[1], [0], [0], [1], [0, 0, 1, 1], [], []>} : vector<2x32xf32>, vector<32x32xf32>, vector<2x32xf32> -> vector<2x32xf32>
    %cst_44 = arith.constant dense<0.000000e+00> : vector<2x32xf32>
    %59 = tpu.matmul %52, %24, %cst_44 {dimension_numbers = #tpu.dot_dimension_numbers<[1], [0], [0], [1], [0, 0, 1, 1], [], []>} : vector<2x32xf32>, vector<32x32xf32>, vector<2x32xf32> -> vector<2x32xf32>
    %60 = arith.addf %58, %59 : vector<2x32xf32>
    %61 = vector.broadcast %26 : vector<1x32xf32> to vector<2x32xf32>
    %62 = arith.addf %60, %61 : vector<2x32xf32>
    %cst_45 = arith.constant 0.000000e+00 : f32
    %63 = vector.broadcast %cst_45 : f32 to vector<2x32xf32>
    %64 = arith.maximumf %62, %63 : vector<2x32xf32>
    %65 = vector.extract_strided_slice %29 {offsets = [2, 0], sizes = [2, 32], strides = [1, 1]} : vector<16x32xf32> to vector<2x32xf32>
    %cst_46 = arith.constant dense<0.000000e+00> : vector<2x32xf32>
    %66 = tpu.matmul %57, %23, %cst_46 {dimension_numbers = #tpu.dot_dimension_numbers<[1], [0], [0], [1], [0, 0, 1, 1], [], []>} : vector<2x32xf32>, vector<32x32xf32>, vector<2x32xf32> -> vector<2x32xf32>
    %67 = arith.addf %65, %66 : vector<2x32xf32>
    %cst_47 = arith.constant 0.000000e+00 : f32
    %68 = vector.broadcast %cst_47 : f32 to vector<2x32xf32>
    %69 = arith.maximumf %67, %68 : vector<2x32xf32>
    %cst_48 = arith.constant dense<0.000000e+00> : vector<2x32xf32>
    %70 = tpu.matmul %69, %22, %cst_48 {dimension_numbers = #tpu.dot_dimension_numbers<[1], [0], [0], [1], [0, 0, 1, 1], [], []>} : vector<2x32xf32>, vector<32x32xf32>, vector<2x32xf32> -> vector<2x32xf32>
    %cst_49 = arith.constant dense<0.000000e+00> : vector<2x32xf32>
    %71 = tpu.matmul %64, %24, %cst_49 {dimension_numbers = #tpu.dot_dimension_numbers<[1], [0], [0], [1], [0, 0, 1, 1], [], []>} : vector<2x32xf32>, vector<32x32xf32>, vector<2x32xf32> -> vector<2x32xf32>
    %72 = arith.addf %70, %71 : vector<2x32xf32>
    %73 = vector.broadcast %26 : vector<1x32xf32> to vector<2x32xf32>
    %74 = arith.addf %72, %73 : vector<2x32xf32>
    %cst_50 = arith.constant 0.000000e+00 : f32
    %75 = vector.broadcast %cst_50 : f32 to vector<2x32xf32>
    %76 = arith.maximumf %74, %75 : vector<2x32xf32>
    %77 = vector.extract_strided_slice %29 {offsets = [4, 0], sizes = [2, 32], strides = [1, 1]} : vector<16x32xf32> to vector<2x32xf32>
    %cst_51 = arith.constant dense<0.000000e+00> : vector<2x32xf32>
    %78 = tpu.matmul %69, %23, %cst_51 {dimension_numbers = #tpu.dot_dimension_numbers<[1], [0], [0], [1], [0, 0, 1, 1], [], []>} : vector<2x32xf32>, vector<32x32xf32>, vector<2x32xf32> -> vector<2x32xf32>
    %79 = arith.addf %77, %78 : vector<2x32xf32>
    %cst_52 = arith.constant 0.000000e+00 : f32
    %80 = vector.broadcast %cst_52 : f32 to vector<2x32xf32>
    %81 = arith.maximumf %79, %80 : vector<2x32xf32>
    %cst_53 = arith.constant dense<0.000000e+00> : vector<2x32xf32>
    %82 = tpu.matmul %81, %22, %cst_53 {dimension_numbers = #tpu.dot_dimension_numbers<[1], [0], [0], [1], [0, 0, 1, 1], [], []>} : vector<2x32xf32>, vector<32x32xf32>, vector<2x32xf32> -> vector<2x32xf32>
    %cst_54 = arith.constant dense<0.000000e+00> : vector<2x32xf32>
    %83 = tpu.matmul %76, %24, %cst_54 {dimension_numbers = #tpu.dot_dimension_numbers<[1], [0], [0], [1], [0, 0, 1, 1], [], []>} : vector<2x32xf32>, vector<32x32xf32>, vector<2x32xf32> -> vector<2x32xf32>
    %84 = arith.addf %82, %83 : vector<2x32xf32>
    %85 = vector.broadcast %26 : vector<1x32xf32> to vector<2x32xf32>
    %86 = arith.addf %84, %85 : vector<2x32xf32>
    %cst_55 = arith.constant 0.000000e+00 : f32
    %87 = vector.broadcast %cst_55 : f32 to vector<2x32xf32>
    %88 = arith.maximumf %86, %87 : vector<2x32xf32>
    %89 = vector.extract_strided_slice %29 {offsets = [6, 0], sizes = [2, 32], strides = [1, 1]} : vector<16x32xf32> to vector<2x32xf32>
    %cst_56 = arith.constant dense<0.000000e+00> : vector<2x32xf32>
    %90 = tpu.matmul %81, %23, %cst_56 {dimension_numbers = #tpu.dot_dimension_numbers<[1], [0], [0], [1], [0, 0, 1, 1], [], []>} : vector<2x32xf32>, vector<32x32xf32>, vector<2x32xf32> -> vector<2x32xf32>
    %91 = arith.addf %89, %90 : vector<2x32xf32>
    %cst_57 = arith.constant 0.000000e+00 : f32
    %92 = vector.broadcast %cst_57 : f32 to vector<2x32xf32>
    %93 = arith.maximumf %91, %92 : vector<2x32xf32>
    %cst_58 = arith.constant dense<0.000000e+00> : vector<2x32xf32>
    %94 = tpu.matmul %93, %22, %cst_58 {dimension_numbers = #tpu.dot_dimension_numbers<[1], [0], [0], [1], [0, 0, 1, 1], [], []>} : vector<2x32xf32>, vector<32x32xf32>, vector<2x32xf32> -> vector<2x32xf32>
    %cst_59 = arith.constant dense<0.000000e+00> : vector<2x32xf32>
    %95 = tpu.matmul %88, %24, %cst_59 {dimension_numbers = #tpu.dot_dimension_numbers<[1], [0], [0], [1], [0, 0, 1, 1], [], []>} : vector<2x32xf32>, vector<32x32xf32>, vector<2x32xf32> -> vector<2x32xf32>
    %96 = arith.addf %94, %95 : vector<2x32xf32>
    %97 = vector.broadcast %26 : vector<1x32xf32> to vector<2x32xf32>
    %98 = arith.addf %96, %97 : vector<2x32xf32>
    %cst_60 = arith.constant 0.000000e+00 : f32
    %99 = vector.broadcast %cst_60 : f32 to vector<2x32xf32>
    %100 = arith.maximumf %98, %99 : vector<2x32xf32>
    %101 = vector.extract_strided_slice %29 {offsets = [8, 0], sizes = [2, 32], strides = [1, 1]} : vector<16x32xf32> to vector<2x32xf32>
    %cst_61 = arith.constant dense<0.000000e+00> : vector<2x32xf32>
    %102 = tpu.matmul %93, %23, %cst_61 {dimension_numbers = #tpu.dot_dimension_numbers<[1], [0], [0], [1], [0, 0, 1, 1], [], []>} : vector<2x32xf32>, vector<32x32xf32>, vector<2x32xf32> -> vector<2x32xf32>
    %103 = arith.addf %101, %102 : vector<2x32xf32>
    %cst_62 = arith.constant 0.000000e+00 : f32
    %104 = vector.broadcast %cst_62 : f32 to vector<2x32xf32>
    %105 = arith.maximumf %103, %104 : vector<2x32xf32>
    %cst_63 = arith.constant dense<0.000000e+00> : vector<2x32xf32>
    %106 = tpu.matmul %105, %22, %cst_63 {dimension_numbers = #tpu.dot_dimension_numbers<[1], [0], [0], [1], [0, 0, 1, 1], [], []>} : vector<2x32xf32>, vector<32x32xf32>, vector<2x32xf32> -> vector<2x32xf32>
    %cst_64 = arith.constant dense<0.000000e+00> : vector<2x32xf32>
    %107 = tpu.matmul %100, %24, %cst_64 {dimension_numbers = #tpu.dot_dimension_numbers<[1], [0], [0], [1], [0, 0, 1, 1], [], []>} : vector<2x32xf32>, vector<32x32xf32>, vector<2x32xf32> -> vector<2x32xf32>
    %108 = arith.addf %106, %107 : vector<2x32xf32>
    %109 = vector.broadcast %26 : vector<1x32xf32> to vector<2x32xf32>
    %110 = arith.addf %108, %109 : vector<2x32xf32>
    %cst_65 = arith.constant 0.000000e+00 : f32
    %111 = vector.broadcast %cst_65 : f32 to vector<2x32xf32>
    %112 = arith.maximumf %110, %111 : vector<2x32xf32>
    %113 = vector.extract_strided_slice %29 {offsets = [10, 0], sizes = [2, 32], strides = [1, 1]} : vector<16x32xf32> to vector<2x32xf32>
    %cst_66 = arith.constant dense<0.000000e+00> : vector<2x32xf32>
    %114 = tpu.matmul %105, %23, %cst_66 {dimension_numbers = #tpu.dot_dimension_numbers<[1], [0], [0], [1], [0, 0, 1, 1], [], []>} : vector<2x32xf32>, vector<32x32xf32>, vector<2x32xf32> -> vector<2x32xf32>
    %115 = arith.addf %113, %114 : vector<2x32xf32>
    %cst_67 = arith.constant 0.000000e+00 : f32
    %116 = vector.broadcast %cst_67 : f32 to vector<2x32xf32>
    %117 = arith.maximumf %115, %116 : vector<2x32xf32>
    %cst_68 = arith.constant dense<0.000000e+00> : vector<2x32xf32>
    %118 = tpu.matmul %117, %22, %cst_68 {dimension_numbers = #tpu.dot_dimension_numbers<[1], [0], [0], [1], [0, 0, 1, 1], [], []>} : vector<2x32xf32>, vector<32x32xf32>, vector<2x32xf32> -> vector<2x32xf32>
    %cst_69 = arith.constant dense<0.000000e+00> : vector<2x32xf32>
    %119 = tpu.matmul %112, %24, %cst_69 {dimension_numbers = #tpu.dot_dimension_numbers<[1], [0], [0], [1], [0, 0, 1, 1], [], []>} : vector<2x32xf32>, vector<32x32xf32>, vector<2x32xf32> -> vector<2x32xf32>
    %120 = arith.addf %118, %119 : vector<2x32xf32>
    %121 = vector.broadcast %26 : vector<1x32xf32> to vector<2x32xf32>
    %122 = arith.addf %120, %121 : vector<2x32xf32>
    %cst_70 = arith.constant 0.000000e+00 : f32
    %123 = vector.broadcast %cst_70 : f32 to vector<2x32xf32>
    %124 = arith.maximumf %122, %123 : vector<2x32xf32>
    %125 = vector.extract_strided_slice %29 {offsets = [12, 0], sizes = [2, 32], strides = [1, 1]} : vector<16x32xf32> to vector<2x32xf32>
    %cst_71 = arith.constant dense<0.000000e+00> : vector<2x32xf32>
    %126 = tpu.matmul %117, %23, %cst_71 {dimension_numbers = #tpu.dot_dimension_numbers<[1], [0], [0], [1], [0, 0, 1, 1], [], []>} : vector<2x32xf32>, vector<32x32xf32>, vector<2x32xf32> -> vector<2x32xf32>
    %127 = arith.addf %125, %126 : vector<2x32xf32>
    %cst_72 = arith.constant 0.000000e+00 : f32
    %128 = vector.broadcast %cst_72 : f32 to vector<2x32xf32>
    %129 = arith.maximumf %127, %128 : vector<2x32xf32>
    %cst_73 = arith.constant dense<0.000000e+00> : vector<2x32xf32>
    %130 = tpu.matmul %129, %22, %cst_73 {dimension_numbers = #tpu.dot_dimension_numbers<[1], [0], [0], [1], [0, 0, 1, 1], [], []>} : vector<2x32xf32>, vector<32x32xf32>, vector<2x32xf32> -> vector<2x32xf32>
    %cst_74 = arith.constant dense<0.000000e+00> : vector<2x32xf32>
    %131 = tpu.matmul %124, %24, %cst_74 {dimension_numbers = #tpu.dot_dimension_numbers<[1], [0], [0], [1], [0, 0, 1, 1], [], []>} : vector<2x32xf32>, vector<32x32xf32>, vector<2x32xf32> -> vector<2x32xf32>
    %132 = arith.addf %130, %131 : vector<2x32xf32>
    %133 = vector.broadcast %26 : vector<1x32xf32> to vector<2x32xf32>
    %134 = arith.addf %132, %133 : vector<2x32xf32>
    %cst_75 = arith.constant 0.000000e+00 : f32
    %135 = vector.broadcast %cst_75 : f32 to vector<2x32xf32>
    %136 = arith.maximumf %134, %135 : vector<2x32xf32>
    %137 = vector.extract_strided_slice %29 {offsets = [14, 0], sizes = [2, 32], strides = [1, 1]} : vector<16x32xf32> to vector<2x32xf32>
    %cst_76 = arith.constant dense<0.000000e+00> : vector<2x32xf32>
    %138 = tpu.matmul %129, %23, %cst_76 {dimension_numbers = #tpu.dot_dimension_numbers<[1], [0], [0], [1], [0, 0, 1, 1], [], []>} : vector<2x32xf32>, vector<32x32xf32>, vector<2x32xf32> -> vector<2x32xf32>
    %139 = arith.addf %137, %138 : vector<2x32xf32>
    %cst_77 = arith.constant 0.000000e+00 : f32
    %140 = vector.broadcast %cst_77 : f32 to vector<2x32xf32>
    %141 = arith.maximumf %139, %140 : vector<2x32xf32>
    %cst_78 = arith.constant dense<0.000000e+00> : vector<2x32xf32>
    %142 = tpu.matmul %141, %22, %cst_78 {dimension_numbers = #tpu.dot_dimension_numbers<[1], [0], [0], [1], [0, 0, 1, 1], [], []>} : vector<2x32xf32>, vector<32x32xf32>, vector<2x32xf32> -> vector<2x32xf32>
    %cst_79 = arith.constant dense<0.000000e+00> : vector<2x32xf32>
    %143 = tpu.matmul %136, %24, %cst_79 {dimension_numbers = #tpu.dot_dimension_numbers<[1], [0], [0], [1], [0, 0, 1, 1], [], []>} : vector<2x32xf32>, vector<32x32xf32>, vector<2x32xf32> -> vector<2x32xf32>
    %144 = arith.addf %142, %143 : vector<2x32xf32>
    %145 = vector.broadcast %26 : vector<1x32xf32> to vector<2x32xf32>
    %146 = arith.addf %144, %145 : vector<2x32xf32>
    %cst_80 = arith.constant 0.000000e+00 : f32
    %147 = vector.broadcast %cst_80 : f32 to vector<2x32xf32>
    %148 = arith.maximumf %146, %147 : vector<2x32xf32>
    %149 = vector.extract_strided_slice %52 {offsets = [0, 0], sizes = [1, 32], strides = [1, 1]} : vector<2x32xf32> to vector<1x32xf32>
    %150 = vector.extract_strided_slice %64 {offsets = [0, 0], sizes = [1, 32], strides = [1, 1]} : vector<2x32xf32> to vector<1x32xf32>
    %151 = vector.extract_strided_slice %76 {offsets = [0, 0], sizes = [1, 32], strides = [1, 1]} : vector<2x32xf32> to vector<1x32xf32>
    %152 = vector.extract_strided_slice %88 {offsets = [0, 0], sizes = [1, 32], strides = [1, 1]} : vector<2x32xf32> to vector<1x32xf32>
    %153 = vector.extract_strided_slice %100 {offsets = [0, 0], sizes = [1, 32], strides = [1, 1]} : vector<2x32xf32> to vector<1x32xf32>
    %154 = vector.extract_strided_slice %112 {offsets = [0, 0], sizes = [1, 32], strides = [1, 1]} : vector<2x32xf32> to vector<1x32xf32>
    %155 = vector.extract_strided_slice %124 {offsets = [0, 0], sizes = [1, 32], strides = [1, 1]} : vector<2x32xf32> to vector<1x32xf32>
    %156 = vector.extract_strided_slice %136 {offsets = [0, 0], sizes = [1, 32], strides = [1, 1]} : vector<2x32xf32> to vector<1x32xf32>
    %157 = vector.extract_strided_slice %148 {offsets = [0, 0], sizes = [1, 32], strides = [1, 1]} : vector<2x32xf32> to vector<1x32xf32>
    %158 = vector.extract_strided_slice %52 {offsets = [1, 0], sizes = [1, 32], strides = [1, 1]} : vector<2x32xf32> to vector<1x32xf32>
    %159 = vector.extract_strided_slice %64 {offsets = [1, 0], sizes = [1, 32], strides = [1, 1]} : vector<2x32xf32> to vector<1x32xf32>
    %160 = vector.extract_strided_slice %76 {offsets = [1, 0], sizes = [1, 32], strides = [1, 1]} : vector<2x32xf32> to vector<1x32xf32>
    %161 = vector.extract_strided_slice %88 {offsets = [1, 0], sizes = [1, 32], strides = [1, 1]} : vector<2x32xf32> to vector<1x32xf32>
    %162 = vector.extract_strided_slice %100 {offsets = [1, 0], sizes = [1, 32], strides = [1, 1]} : vector<2x32xf32> to vector<1x32xf32>
    %163 = vector.extract_strided_slice %112 {offsets = [1, 0], sizes = [1, 32], strides = [1, 1]} : vector<2x32xf32> to vector<1x32xf32>
    %164 = vector.extract_strided_slice %124 {offsets = [1, 0], sizes = [1, 32], strides = [1, 1]} : vector<2x32xf32> to vector<1x32xf32>
    %165 = vector.extract_strided_slice %136 {offsets = [1, 0], sizes = [1, 32], strides = [1, 1]} : vector<2x32xf32> to vector<1x32xf32>
    %166 = vector.extract_strided_slice %148 {offsets = [1, 0], sizes = [1, 32], strides = [1, 1]} : vector<2x32xf32> to vector<1x32xf32>
    %167 = tpu.concatenate %149, %150, %151, %152, %153, %154, %155, %156, %157, %158, %159, %160, %161, %162, %163, %164 in 0 : vector<1x32xf32>, vector<1x32xf32>, vector<1x32xf32>, vector<1x32xf32>, vector<1x32xf32>, vector<1x32xf32>, vector<1x32xf32>, vector<1x32xf32>, vector<1x32xf32>, vector<1x32xf32>, vector<1x32xf32>, vector<1x32xf32>, vector<1x32xf32>, vector<1x32xf32>, vector<1x32xf32>, vector<1x32xf32> -> vector<16x32xf32>
    %168 = tpu.concatenate %165, %166 in 0 : vector<1x32xf32>, vector<1x32xf32> -> vector<2x32xf32>
    %169 = tpu.concatenate %167, %168 in 0 : vector<16x32xf32>, vector<2x32xf32> -> vector<18x32xf32>
    %c0_81 = arith.constant 0 : index
    %c0_82 = arith.constant 0 : index
    %170 = vector.load %arg13[%c0_81, %c0_82] : memref<32x128xf32, #tpu.memory_space<vmem>>, vector<32x128xf32>
    %cst_83 = arith.constant dense<0.000000e+00> : vector<18x128xf32>
    %171 = tpu.matmul %169, %170, %cst_83 {dimension_numbers = #tpu.dot_dimension_numbers<[1], [0], [0], [1], [0, 0, 1, 1], [], []>} : vector<18x32xf32>, vector<32x128xf32>, vector<18x128xf32> -> vector<18x128xf32>
    %c0_84 = arith.constant 0 : index
    %c0_85 = arith.constant 0 : index
    %172 = vector.load %arg14[%c0_84, %c0_85] : memref<1x128xf32, #tpu.memory_space<vmem>>, vector<1x128xf32>
    %173 = vector.broadcast %172 : vector<1x128xf32> to vector<18x128xf32>
    %174 = arith.addf %171, %173 : vector<18x128xf32>
    %c0_86 = arith.constant 0 : index
    %c0_87 = arith.constant 0 : index
    %175 = vector.load %arg15[%c0_86, %c0_87] : memref<18x128xf32, #tpu.memory_space<vmem>>, vector<18x128xf32>
    tpu.vector_store %arg15[%c0_86, %c0_87], %174 {strides = array<i32>} : memref<18x128xf32, #tpu.memory_space<vmem>>, vector<18x128xf32>,
    return
  }
}

</mosaic_0001>

<bundles_post_ra>
// kernel: forward.1
= control target key start
LH: loop header
LB: loop body
LE: loop exit
PB: predicated region body
PF: predicated region fallthrough
CT: control target
= control target key end

     0   :  { %s4760_s0 = inlined_call_operand.vmem [shape: f32[2,4,256], index: 0, kind: input, shape index: {}]   ;;  %s4761_s1 = inlined_call_operand.vmem [shape: s32[16,1], index: 1, kind: input, shape index: {}]   ;;  %s4762_s2 = inlined_call_operand.vmem [shape: f32[4,2048], index: 2, kind: input, shape index: {}]   ;;  %s4763_s3 = inlined_call_operand.vmem [shape: f32[1,2048], index: 3, kind: input, shape index: {}]   ;;  %s4764_s4 = inlined_call_operand.vmem [shape: f32[2048,32], index: 4, kind: input, shape index: {}]   ;;  %s4765_s5 = inlined_call_operand.vmem [shape: f32[1,32], index: 5, kind: input, shape index: {}]   ;;  %s4766_s6 = inlined_call_operand.vmem [shape: f32[64,32], index: 6, kind: input, shape index: {}]   ;;  %s4767_s7 = inlined_call_operand.vmem [shape: f32[32,32], index: 7, kind: input, shape index: {}]   ;;  %s4768_s8 = inlined_call_operand.vmem [shape: f32[32,32], index: 8, kind: input, shape index: {}]   ;;  %s4769_s9 = inlined_call_operand.vmem [shape: f32[1,32], index: 9, kind: input, shape index: {}]   ;;  %s4770_s10 = inlined_call_operand.vmem [shape: f32[32,32], index: 10, kind: input, shape index: {}]   ;;  %s4771_s11 = inlined_call_operand.vmem [shape: f32[32,32], index: 11, kind: input, shape index: {}]   ;;  %s4772_s12 = inlined_call_operand.vmem [shape: f32[1,32], index: 12, kind: input, shape index: {}]   ;;  %s4773_s13 = inlined_call_operand.vmem [shape: f32[32,128], index: 13, kind: input, shape index: {}]   ;;  %s4774_s14 = inlined_call_operand.vmem [shape: f32[1,128], index: 14, kind: input, shape index: {}]   ;;  %s4775_s15 = inlined_call_operand.vmem [shape: f32[18,128], index: 15, kind: output, shape index: {}]  }
   0x1   :  { %v2696_v0 = vld [vmem:[%s4764_s4] sm:$0xff]  ;;  %v2701_v1 = vld [vmem:[%s4764_s4 + $0x8] sm:$0xff]  ;;  %v2706_v2 = vld [vmem:[%s4764_s4 + $0x10] sm:$0xff] }
   0x2   :  { %4803 = vst [vmem:[#allocation6_spill] sm:$0xff] %v2696_v0  ;;  %v2711_v3 = vld [vmem:[%s4764_s4 + $0x18] sm:$0xff]  ;;  %v2716_v4 = vld [vmem:[%s4764_s4 + $0x20] sm:$0xff]  ;;  %v2721_v5 = vld [vmem:[%s4764_s4 + $0x28] sm:$0xff] }
   0x3   :  { %4804 = vst [vmem:[#allocation7_spill] sm:$0xff] %v2701_v1  ;;  %v2726_v6 = vld [vmem:[%s4764_s4 + $0x30] sm:$0xff]  ;;  %v2731_v7 = vld [vmem:[%s4764_s4 + $0x38] sm:$0xff]  ;;  %v2736_v8 = vld [vmem:[%s4764_s4 + $0x40] sm:$0xff] }
   0x4   :  { %4805 = vst [vmem:[#allocation8_spill] sm:$0xff] %v2706_v2  ;;  %v2741_v9 = vld [vmem:[%s4764_s4 + $0x48] sm:$0xff]  ;;  %v2746_v10 = vld [vmem:[%s4764_s4 + $0x50] sm:$0xff]  ;;  %v2751_v11 = vld [vmem:[%s4764_s4 + $0x58] sm:$0xff] }
   0x5   :  { %4806 = vst [vmem:[#allocation9_spill] sm:$0xff] %v2711_v3  ;;  %v2756_v12 = vld [vmem:[%s4764_s4 + $0x60] sm:$0xff]  ;;  %v2761_v13 = vld [vmem:[%s4764_s4 + $0x68] sm:$0xff]  ;;  %v2766_v14 = vld [vmem:[%s4764_s4 + $0x70] sm:$0xff] }
   0x6   :  { %4807 = vst [vmem:[#allocation10_spill] sm:$0xff] %v2716_v4  ;;  %v2771_v15 = vld [vmem:[%s4764_s4 + $0x78] sm:$0xff]  ;;  %v2776_v16 = vld [vmem:[%s4764_s4 + $0x80] sm:$0xff]  ;;  %v2781_v17 = vld [vmem:[%s4764_s4 + $0x88] sm:$0xff] }
   0x7   :  { %4808 = vst [vmem:[#allocation11_spill] sm:$0xff] %v2776_v16  ;;  %v2786_v18 = vld [vmem:[%s4764_s4 + $0x90] sm:$0xff]  ;;  %v2791_v19 = vld [vmem:[%s4764_s4 + $0x98] sm:$0xff]  ;;  %v2796_v20 = vld [vmem:[%s4764_s4 + $0xa0] sm:$0xff] }
   0x8   :  { %4809 = vst [vmem:[#allocation12_spill] sm:$0xff] %v2781_v17  ;;  %v2801_v21 = vld [vmem:[%s4764_s4 + $0xa8] sm:$0xff]  ;;  %v2806_v22 = vld [vmem:[%s4764_s4 + $0xb0] sm:$0xff]  ;;  %v2811_v23 = vld [vmem:[%s4764_s4 + $0xb8] sm:$0xff] }
   0x9   :  { %4810 = vst [vmem:[#allocation13_spill] sm:$0xff] %v2786_v18  ;;  %v2816_v24 = vld [vmem:[%s4764_s4 + $0xc0] sm:$0xff]  ;;  %v2821_v25 = vld [vmem:[%s4764_s4 + $0xc8] sm:$0xff]  ;;  %v2826_v26 = vld [vmem:[%s4764_s4 + $0xd0] sm:$0xff] }
   0xa   :  { %4811 = vst [vmem:[#allocation14_spill] sm:$0xff] %v2791_v19  ;;  %v2831_v27 = vld [vmem:[%s4764_s4 + $0xd8] sm:$0xff]  ;;  %v2836_v28 = vld [vmem:[%s4764_s4 + $0xe0] sm:$0xff]  ;;  %v2841_v29 = vld [vmem:[%s4764_s4 + $0xe8] sm:$0xff] }
   0xb   :  { %4812 = vst [vmem:[#allocation15_spill] sm:$0xff] %v2796_v20  ;;  %v2846_v30 = vld [vmem:[%s4764_s4 + $0xf0] sm:$0xff]  ;;  %v2851_v31 = vld [vmem:[%s4764_s4 + $0xf8] sm:$0xff]  ;;  %v2856_v32 = vld [vmem:[%s4764_s4 + $0x100] sm:$0xff] }
   0xc   :  { %4813 = vst [vmem:[#allocation16_spill] sm:$0xff] %v2856_v32  ;;  %v2861_v33 = vld [vmem:[%s4764_s4 + $0x108] sm:$0xff]  ;;  %v2866_v34 = vld [vmem:[%s4764_s4 + $0x110] sm:$0xff]  ;;  %v2871_v35 = vld [vmem:[%s4764_s4 + $0x118] sm:$0xff] }
   0xd   :  { %4814 = vst [vmem:[#allocation17_spill] sm:$0xff] %v2861_v33  ;;  %v2876_v36 = vld [vmem:[%s4764_s4 + $0x120] sm:$0xff]  ;;  %v2881_v37 = vld [vmem:[%s4764_s4 + $0x128] sm:$0xff]  ;;  %v2886_v38 = vld [vmem:[%s4764_s4 + $0x130] sm:$0xff] }
   0xe   :  { %4815 = vst [vmem:[#allocation18_spill] sm:$0xff] %v2866_v34  ;;  %v2891_v39 = vld [vmem:[%s4764_s4 + $0x138] sm:$0xff]  ;;  %v2896_v40 = vld [vmem:[%s4764_s4 + $0x140] sm:$0xff]  ;;  %v2901_v41 = vld [vmem:[%s4764_s4 + $0x148] sm:$0xff] }
   0xf   :  { %4816 = vst [vmem:[#allocation19_spill] sm:$0xff] %v2871_v35  ;;  %v2906_v42 = vld [vmem:[%s4764_s4 + $0x150] sm:$0xff]  ;;  %v2911_v43 = vld [vmem:[%s4764_s4 + $0x158] sm:$0xff]  ;;  %v2916_v44 = vld [vmem:[%s4764_s4 + $0x160] sm:$0xff] }
  0x10   :  { %4817 = vst [vmem:[#allocation20_spill] sm:$0xff] %v2876_v36  ;;  %v2921_v45 = vld [vmem:[%s4764_s4 + $0x168] sm:$0xff]  ;;  %v2926_v46 = vld [vmem:[%s4764_s4 + $0x170] sm:$0xff]  ;;  %v2931_v47 = vld [vmem:[%s4764_s4 + $0x178] sm:$0xff] }
  0x11   :  { %v2936_v48 = vld [vmem:[%s4764_s4 + $0x180] sm:$0xff]  ;;  %v2941_v49 = vld [vmem:[%s4764_s4 + $0x188] sm:$0xff]  ;;  %v2946_v50 = vld [vmem:[%s4764_s4 + $0x190] sm:$0xff] }
  0x12   :  { %4818 = vst [vmem:[#allocation21_spill] sm:$0xff] %v2936_v48  ;;  %v2951_v51 = vld [vmem:[%s4764_s4 + $0x198] sm:$0xff]  ;;  %v2956_v52 = vld [vmem:[%s4764_s4 + $0x1a0] sm:$0xff]  ;;  %v2961_v53 = vld [vmem:[%s4764_s4 + $0x1a8] sm:$0xff] }
  0x13   :  { %4819 = vst [vmem:[#allocation22_spill] sm:$0xff] %v2941_v49  ;;  %v2966_v54 = vld [vmem:[%s4764_s4 + $0x1b0] sm:$0xff]  ;;  %v2971_v55 = vld [vmem:[%s4764_s4 + $0x1b8] sm:$0xff]  ;;  %v2976_v56 = vld [vmem:[%s4764_s4 + $0x1c0] sm:$0xff] }
  0x14   :  { %4820 = vst [vmem:[#allocation23_spill] sm:$0xff] %v2946_v50  ;;  %v2981_v57 = vld [vmem:[%s4764_s4 + $0x1c8] sm:$0xff]  ;;  %v2986_v58 = vld [vmem:[%s4764_s4 + $0x1d0] sm:$0xff]  ;;  %v2991_v59 = vld [vmem:[%s4764_s4 + $0x1d8] sm:$0xff] }
  0x15   :  { %4821 = vst [vmem:[#allocation24_spill] sm:$0xff] %v2951_v51  ;;  %v2996_v60 = vld [vmem:[%s4764_s4 + $0x1e0] sm:$0xff]  ;;  %v3001_v61 = vld [vmem:[%s4764_s4 + $0x1e8] sm:$0xff]  ;;  %v3006_v62 = vld [vmem:[%s4764_s4 + $0x1f0] sm:$0xff] }
  0x16   :  { %4822 = vst [vmem:[#allocation25_spill] sm:$0xff] %v2956_v52  ;;  %v3011_v63 = vld [vmem:[%s4764_s4 + $0x1f8] sm:$0xff]  ;;  %v3016_v48 = vld [vmem:[%s4764_s4 + $0x200] sm:$0xff]  ;;  %v3021_v32 = vld [vmem:[%s4764_s4 + $0x208] sm:$0xff] }
  0x17   :  { %4823 = vst [vmem:[#allocation26_spill] sm:$0xff] %v3016_v48  ;;  %v3026_v16 = vld [vmem:[%s4764_s4 + $0x210] sm:$0xff]  ;;  %v3031_v0 = vld [vmem:[%s4764_s4 + $0x218] sm:$0xff]  ;;  %v3036_v49 = vld [vmem:[%s4764_s4 + $0x220] sm:$0xff] }
  0x18   :  { %4824 = vst [vmem:[#allocation27_spill] sm:$0xff] %v3021_v32  ;;  %v3041_v48 = vld [vmem:[%s4764_s4 + $0x228] sm:$0xff]  ;;  %v3046_v32 = vld [vmem:[%s4764_s4 + $0x230] sm:$0xff] }
  0x19   :  { %4825 = vst [vmem:[#allocation28_spill] sm:$0xff] %v3026_v16  ;;  %v3051_v16 = vld [vmem:[%s4764_s4 + $0x238] sm:$0xff] }
  0x1a   :  { %4826 = vst [vmem:[#allocation29_spill] sm:$0xff] %v3031_v0  ;;  %v3056_v0 = vld [vmem:[%s4764_s4 + $0x240] sm:$0xff] }
  0x1b   :  { %4827 = vst [vmem:[#allocation30_spill] sm:$0xff] %v3036_v49  ;;  %v3061_v49 = vld [vmem:[%s4764_s4 + $0x248] sm:$0xff] }
  0x1c   :  { %4828 = vst [vmem:[#allocation31_spill] sm:$0xff] %v3041_v48  ;;  %v3066_v48 = vld [vmem:[%s4764_s4 + $0x250] sm:$0xff] }
  0x1d   :  { %4829 = vst [vmem:[#allocation32_spill] sm:$0xff] %v3046_v32  ;;  %v3071_v32 = vld [vmem:[%s4764_s4 + $0x258] sm:$0xff] }
  0x1e   :  { %4830 = vst [vmem:[#allocation33_spill] sm:$0xff] %v3051_v16  ;;  %v3076_v16 = vld [vmem:[%s4764_s4 + $0x260] sm:$0xff] }
  0x1f   :  { %4831 = vst [vmem:[#allocation34_spill] sm:$0xff] %v3056_v0  ;;  %v3081_v0 = vld [vmem:[%s4764_s4 + $0x268] sm:$0xff] }
  0x20   :  { %4832 = vst [vmem:[#allocation35_spill] sm:$0xff] %v3061_v49  ;;  %v3086_v49 = vld [vmem:[%s4764_s4 + $0x270] sm:$0xff] }
  0x21   :  { %4833 = vst [vmem:[#allocation36_spill] sm:$0xff] %v3066_v48  ;;  %v3091_v48 = vld [vmem:[%s4764_s4 + $0x278] sm:$0xff] }
  0x22   :  { %4834 = vst [vmem:[#allocation37_spill] sm:$0xff] %v3071_v32  ;;  %v3096_v32 = vld [vmem:[%s4764_s4 + $0x280] sm:$0xff] }
  0x23   :  { %4835 = vst [vmem:[#allocation38_spill] sm:$0xff] %v3076_v16  ;;  %v3101_v16 = vld [vmem:[%s4764_s4 + $0x288] sm:$0xff] }
  0x24   :  { %4836 = vst [vmem:[#allocation39_spill] sm:$0xff] %v3081_v0  ;;  %v3106_v0 = vld [vmem:[%s4764_s4 + $0x290] sm:$0xff] }
  0x25   :  { %4837 = vst [vmem:[#allocation40_spill] sm:$0xff] %v3086_v49  ;;  %v3111_v49 = vld [vmem:[%s4764_s4 + $0x298] sm:$0xff] }
  0x26   :  { %4838 = vst [vmem:[#allocation41_spill] sm:$0xff] %v3091_v48  ;;  %v3116_v48 = vld [vmem:[%s4764_s4 + $0x2a0] sm:$0xff] }
  0x27   :  { %4839 = vst [vmem:[#allocation42_spill] sm:$0xff] %v3096_v32  ;;  %v3121_v32 = vld [vmem:[%s4764_s4 + $0x2a8] sm:$0xff] }
  0x28   :  { %4840 = vst [vmem:[#allocation43_spill] sm:$0xff] %v3101_v16  ;;  %v3126_v16 = vld [vmem:[%s4764_s4 + $0x2b0] sm:$0xff] }
  0x29   :  { %4841 = vst [vmem:[#allocation44_spill] sm:$0xff] %v3106_v0  ;;  %v3131_v0 = vld [vmem:[%s4764_s4 + $0x2b8] sm:$0xff] }
  0x2a   :  { %4842 = vst [vmem:[#allocation45_spill] sm:$0xff] %v3111_v49  ;;  %v3136_v49 = vld [vmem:[%s4764_s4 + $0x2c0] sm:$0xff] }
  0x2b   :  { %4843 = vst [vmem:[#allocation46_spill] sm:$0xff] %v3116_v48  ;;  %v3141_v48 = vld [vmem:[%s4764_s4 + $0x2c8] sm:$0xff] }
  0x2c   :  { %4844 = vst [vmem:[#allocation47_spill] sm:$0xff] %v3121_v32  ;;  %v3146_v32 = vld [vmem:[%s4764_s4 + $0x2d0] sm:$0xff] }
  0x2d   :  { %4845 = vst [vmem:[#allocation48_spill] sm:$0xff] %v3126_v16  ;;  %v3151_v16 = vld [vmem:[%s4764_s4 + $0x2d8] sm:$0xff] }
  0x2e   :  { %4846 = vst [vmem:[#allocation49_spill] sm:$0xff] %v3131_v0  ;;  %v3156_v0 = vld [vmem:[%s4764_s4 + $0x2e0] sm:$0xff] }
  0x2f   :  { %4847 = vst [vmem:[#allocation50_spill] sm:$0xff] %v3136_v49  ;;  %v3161_v49 = vld [vmem:[%s4764_s4 + $0x2e8] sm:$0xff] }
  0x30   :  { %4848 = vst [vmem:[#allocation51_spill] sm:$0xff] %v3141_v48  ;;  %v3166_v48 = vld [vmem:[%s4764_s4 + $0x2f0] sm:$0xff] }
  0x31   :  { %4849 = vst [vmem:[#allocation52_spill] sm:$0xff] %v3146_v32  ;;  %v3171_v32 = vld [vmem:[%s4764_s4 + $0x2f8] sm:$0xff] }
  0x32   :  { %4850 = vst [vmem:[#allocation53_spill] sm:$0xff] %v3151_v16  ;;  %v3176_v16 = vld [vmem:[%s4764_s4 + $0x300] sm:$0xff] }
  0x33   :  { %4851 = vst [vmem:[#allocation54_spill] sm:$0xff] %v3156_v0  ;;  %v3181_v0 = vld [vmem:[%s4764_s4 + $0x308] sm:$0xff] }
  0x34   :  { %4852 = vst [vmem:[#allocation55_spill] sm:$0xff] %v3161_v49  ;;  %v3186_v49 = vld [vmem:[%s4764_s4 + $0x310] sm:$0xff] }
  0x35   :  { %4853 = vst [vmem:[#allocation56_spill] sm:$0xff] %v3166_v48  ;;  %v3191_v48 = vld [vmem:[%s4764_s4 + $0x318] sm:$0xff] }
  0x36   :  { %4854 = vst [vmem:[#allocation57_spill] sm:$0xff] %v3171_v32  ;;  %v3196_v32 = vld [vmem:[%s4764_s4 + $0x320] sm:$0xff] }
  0x37   :  { %4855 = vst [vmem:[#allocation58_spill] sm:$0xff] %v3176_v16  ;;  %v3201_v16 = vld [vmem:[%s4764_s4 + $0x328] sm:$0xff] }
  0x38   :  { %4856 = vst [vmem:[#allocation59_spill] sm:$0xff] %v3181_v0  ;;  %v3206_v0 = vld [vmem:[%s4764_s4 + $0x330] sm:$0xff] }
  0x39   :  { %4857 = vst [vmem:[#allocation60_spill] sm:$0xff] %v3186_v49  ;;  %v3211_v49 = vld [vmem:[%s4764_s4 + $0x338] sm:$0xff] }
  0x3a   :  { %4858 = vst [vmem:[#allocation61_spill] sm:$0xff] %v3191_v48  ;;  %v3216_v48 = vld [vmem:[%s4764_s4 + $0x340] sm:$0xff] }
  0x3b   :  { %4859 = vst [vmem:[#allocation62_spill] sm:$0xff] %v3196_v32  ;;  %v3221_v32 = vld [vmem:[%s4764_s4 + $0x348] sm:$0xff] }
  0x3c   :  { %4860 = vst [vmem:[#allocation63_spill] sm:$0xff] %v3201_v16  ;;  %v3226_v16 = vld [vmem:[%s4764_s4 + $0x350] sm:$0xff] }
  0x3d   :  { %4861 = vst [vmem:[#allocation64_spill] sm:$0xff] %v3206_v0  ;;  %v3231_v0 = vld [vmem:[%s4764_s4 + $0x358] sm:$0xff] }
  0x3e   :  { %4862 = vst [vmem:[#allocation65_spill] sm:$0xff] %v3211_v49  ;;  %v3236_v49 = vld [vmem:[%s4764_s4 + $0x360] sm:$0xff] }
  0x3f   :  { %4863 = vst [vmem:[#allocation66_spill] sm:$0xff] %v3216_v48  ;;  %v3241_v48 = vld [vmem:[%s4764_s4 + $0x368] sm:$0xff] }
  0x40   :  { %4864 = vst [vmem:[#allocation67_spill] sm:$0xff] %v3221_v32  ;;  %v3246_v32 = vld [vmem:[%s4764_s4 + $0x370] sm:$0xff] }
  0x41   :  { %4865 = vst [vmem:[#allocation68_spill] sm:$0xff] %v3226_v16  ;;  %v3251_v16 = vld [vmem:[%s4764_s4 + $0x378] sm:$0xff] }
  0x42   :  { %4866 = vst [vmem:[#allocation69_spill] sm:$0xff] %v3231_v0  ;;  %v3256_v0 = vld [vmem:[%s4764_s4 + $0x380] sm:$0xff] }
  0x43   :  { %4867 = vst [vmem:[#allocation70_spill] sm:$0xff] %v3236_v49  ;;  %v3261_v49 = vld [vmem:[%s4764_s4 + $0x388] sm:$0xff] }
  0x44   :  { %4868 = vst [vmem:[#allocation71_spill] sm:$0xff] %v3241_v48  ;;  %v3266_v48 = vld [vmem:[%s4764_s4 + $0x390] sm:$0xff] }
  0x45   :  { %4869 = vst [vmem:[#allocation72_spill] sm:$0xff] %v3246_v32  ;;  %v3271_v32 = vld [vmem:[%s4764_s4 + $0x398] sm:$0xff] }
  0x46   :  { %4870 = vst [vmem:[#allocation73_spill] sm:$0xff] %v3251_v16  ;;  %v3276_v16 = vld [vmem:[%s4764_s4 + $0x3a0] sm:$0xff] }
  0x47   :  { %4871 = vst [vmem:[#allocation74_spill] sm:$0xff] %v3256_v0  ;;  %v3281_v0 = vld [vmem:[%s4764_s4 + $0x3a8] sm:$0xff] }
  0x48   :  { %4872 = vst [vmem:[#allocation75_spill] sm:$0xff] %v3261_v49  ;;  %v3286_v49 = vld [vmem:[%s4764_s4 + $0x3b0] sm:$0xff] }
  0x49   :  { %4873 = vst [vmem:[#allocation76_spill] sm:$0xff] %v3266_v48  ;;  %v3291_v48 = vld [vmem:[%s4764_s4 + $0x3b8] sm:$0xff] }
  0x4a   :  { %4874 = vst [vmem:[#allocation77_spill] sm:$0xff] %v3271_v32  ;;  %v3296_v32 = vld [vmem:[%s4764_s4 + $0x3c0] sm:$0xff] }
  0x4b   :  { %4875 = vst [vmem:[#allocation78_spill] sm:$0xff] %v3276_v16  ;;  %v3301_v16 = vld [vmem:[%s4764_s4 + $0x3c8] sm:$0xff] }
  0x4c   :  { %4876 = vst [vmem:[#allocation79_spill] sm:$0xff] %v3281_v0  ;;  %v3306_v0 = vld [vmem:[%s4764_s4 + $0x3d0] sm:$0xff] }
  0x4d   :  { %4877 = vst [vmem:[#allocation80_spill] sm:$0xff] %v3286_v49  ;;  %v3311_v49 = vld [vmem:[%s4764_s4 + $0x3d8] sm:$0xff] }
  0x4e   :  { %4878 = vst [vmem:[#allocation81_spill] sm:$0xff] %v3291_v48  ;;  %v3316_v48 = vld [vmem:[%s4764_s4 + $0x3e0] sm:$0xff] }
  0x4f   :  { %4879 = vst [vmem:[#allocation82_spill] sm:$0xff] %v3296_v32  ;;  %v3321_v32 = vld [vmem:[%s4764_s4 + $0x3e8] sm:$0xff] }
  0x50   :  { %4880 = vst [vmem:[#allocation83_spill] sm:$0xff] %v3301_v16  ;;  %v3326_v16 = vld [vmem:[%s4764_s4 + $0x3f0] sm:$0xff] }
  0x51   :  { %4881 = vst [vmem:[#allocation84_spill] sm:$0xff] %v3306_v0  ;;  %v3331_v0 = vld [vmem:[%s4764_s4 + $0x3f8] sm:$0xff] }
  0x52   :  { %4882 = vst [vmem:[#allocation85_spill] sm:$0xff] %v3311_v49  ;;  %v3336_v49 = vld [vmem:[%s4764_s4 + $0x400] sm:$0xff] }
  0x53   :  { %4883 = vst [vmem:[#allocation86_spill] sm:$0xff] %v3316_v48  ;;  %v3341_v48 = vld [vmem:[%s4764_s4 + $0x408] sm:$0xff] }
  0x54   :  { %4884 = vst [vmem:[#allocation87_spill] sm:$0xff] %v3321_v32  ;;  %v3346_v32 = vld [vmem:[%s4764_s4 + $0x410] sm:$0xff] }
  0x55   :  { %4885 = vst [vmem:[#allocation88_spill] sm:$0xff] %v3326_v16  ;;  %v3351_v16 = vld [vmem:[%s4764_s4 + $0x418] sm:$0xff] }
  0x56   :  { %4886 = vst [vmem:[#allocation89_spill] sm:$0xff] %v3331_v0  ;;  %v3356_v0 = vld [vmem:[%s4764_s4 + $0x420] sm:$0xff] }
  0x57   :  { %4887 = vst [vmem:[#allocation90_spill] sm:$0xff] %v3336_v49  ;;  %v3361_v49 = vld [vmem:[%s4764_s4 + $0x428] sm:$0xff] }
  0x58   :  { %4888 = vst [vmem:[#allocation91_spill] sm:$0xff] %v3341_v48  ;;  %v3366_v48 = vld [vmem:[%s4764_s4 + $0x430] sm:$0xff] }
  0x59   :  { %4889 = vst [vmem:[#allocation92_spill] sm:$0xff] %v3346_v32  ;;  %v3371_v32 = vld [vmem:[%s4764_s4 + $0x438] sm:$0xff] }
  0x5a   :  { %4890 = vst [vmem:[#allocation93_spill] sm:$0xff] %v3351_v16  ;;  %v3376_v16 = vld [vmem:[%s4764_s4 + $0x440] sm:$0xff] }
  0x5b   :  { %4891 = vst [vmem:[#allocation94_spill] sm:$0xff] %v3356_v0  ;;  %v3381_v0 = vld [vmem:[%s4764_s4 + $0x448] sm:$0xff] }
  0x5c   :  { %4892 = vst [vmem:[#allocation95_spill] sm:$0xff] %v3361_v49  ;;  %v3386_v49 = vld [vmem:[%s4764_s4 + $0x450] sm:$0xff] }
  0x5d   :  { %4893 = vst [vmem:[#allocation96_spill] sm:$0xff] %v3366_v48  ;;  %v3391_v48 = vld [vmem:[%s4764_s4 + $0x458] sm:$0xff] }
  0x5e   :  { %4894 = vst [vmem:[#allocation97_spill] sm:$0xff] %v3371_v32  ;;  %v3396_v32 = vld [vmem:[%s4764_s4 + $0x460] sm:$0xff] }
  0x5f   :  { %4895 = vst [vmem:[#allocation98_spill] sm:$0xff] %v3376_v16  ;;  %v3401_v16 = vld [vmem:[%s4764_s4 + $0x468] sm:$0xff] }
  0x60   :  { %4896 = vst [vmem:[#allocation99_spill] sm:$0xff] %v3381_v0  ;;  %v3406_v0 = vld [vmem:[%s4764_s4 + $0x470] sm:$0xff] }
  0x61   :  { %4897 = vst [vmem:[#allocation100_spill] sm:$0xff] %v3386_v49  ;;  %v3411_v49 = vld [vmem:[%s4764_s4 + $0x478] sm:$0xff] }
  0x62   :  { %4898 = vst [vmem:[#allocation101_spill] sm:$0xff] %v3391_v48  ;;  %v3416_v48 = vld [vmem:[%s4764_s4 + $0x480] sm:$0xff] }
  0x63   :  { %4899 = vst [vmem:[#allocation102_spill] sm:$0xff] %v3396_v32  ;;  %v3421_v32 = vld [vmem:[%s4764_s4 + $0x488] sm:$0xff] }
  0x64   :  { %4900 = vst [vmem:[#allocation103_spill] sm:$0xff] %v3401_v16  ;;  %v3426_v16 = vld [vmem:[%s4764_s4 + $0x490] sm:$0xff] }
  0x65   :  { %4901 = vst [vmem:[#allocation104_spill] sm:$0xff] %v3406_v0  ;;  %v3431_v0 = vld [vmem:[%s4764_s4 + $0x498] sm:$0xff] }
  0x66   :  { %4902 = vst [vmem:[#allocation105_spill] sm:$0xff] %v3411_v49  ;;  %v3436_v49 = vld [vmem:[%s4764_s4 + $0x4a0] sm:$0xff] }
  0x67   :  { %4903 = vst [vmem:[#allocation106_spill] sm:$0xff] %v3416_v48  ;;  %v3441_v48 = vld [vmem:[%s4764_s4 + $0x4a8] sm:$0xff] }
  0x68   :  { %4904 = vst [vmem:[#allocation107_spill] sm:$0xff] %v3421_v32  ;;  %v3446_v32 = vld [vmem:[%s4764_s4 + $0x4b0] sm:$0xff] }
  0x69   :  { %4905 = vst [vmem:[#allocation108_spill] sm:$0xff] %v3426_v16  ;;  %v3451_v16 = vld [vmem:[%s4764_s4 + $0x4b8] sm:$0xff] }
  0x6a   :  { %4906 = vst [vmem:[#allocation109_spill] sm:$0xff] %v3431_v0  ;;  %v3456_v0 = vld [vmem:[%s4764_s4 + $0x4c0] sm:$0xff] }
  0x6b   :  { %4907 = vst [vmem:[#allocation110_spill] sm:$0xff] %v3436_v49  ;;  %v3461_v49 = vld [vmem:[%s4764_s4 + $0x4c8] sm:$0xff] }
  0x6c   :  { %4908 = vst [vmem:[#allocation111_spill] sm:$0xff] %v3441_v48  ;;  %v3466_v48 = vld [vmem:[%s4764_s4 + $0x4d0] sm:$0xff] }
  0x6d   :  { %4909 = vst [vmem:[#allocation112_spill] sm:$0xff] %v3446_v32  ;;  %v3471_v32 = vld [vmem:[%s4764_s4 + $0x4d8] sm:$0xff] }
  0x6e   :  { %4910 = vst [vmem:[#allocation113_spill] sm:$0xff] %v3451_v16  ;;  %v3476_v16 = vld [vmem:[%s4764_s4 + $0x4e0] sm:$0xff] }
  0x6f   :  { %4911 = vst [vmem:[#allocation114_spill] sm:$0xff] %v3456_v0  ;;  %v3481_v0 = vld [vmem:[%s4764_s4 + $0x4e8] sm:$0xff] }
  0x70   :  { %4912 = vst [vmem:[#allocation115_spill] sm:$0xff] %v3461_v49  ;;  %v3486_v49 = vld [vmem:[%s4764_s4 + $0x4f0] sm:$0xff] }
  0x71   :  { %4913 = vst [vmem:[#allocation116_spill] sm:$0xff] %v3466_v48  ;;  %v3491_v48 = vld [vmem:[%s4764_s4 + $0x4f8] sm:$0xff] }
  0x72   :  { %4914 = vst [vmem:[#allocation117_spill] sm:$0xff] %v3471_v32  ;;  %v3496_v32 = vld [vmem:[%s4764_s4 + $0x500] sm:$0xff] }
  0x73   :  { %4915 = vst [vmem:[#allocation118_spill] sm:$0xff] %v3476_v16  ;;  %v3501_v16 = vld [vmem:[%s4764_s4 + $0x508] sm:$0xff] }
  0x74   :  { %4916 = vst [vmem:[#allocation119_spill] sm:$0xff] %v3481_v0  ;;  %v3506_v0 = vld [vmem:[%s4764_s4 + $0x510] sm:$0xff] }
  0x75   :  { %4917 = vst [vmem:[#allocation120_spill] sm:$0xff] %v3486_v49  ;;  %v3511_v49 = vld [vmem:[%s4764_s4 + $0x518] sm:$0xff] }
  0x76   :  { %4918 = vst [vmem:[#allocation121_spill] sm:$0xff] %v3491_v48  ;;  %v3516_v48 = vld [vmem:[%s4764_s4 + $0x520] sm:$0xff] }
  0x77   :  { %4919 = vst [vmem:[#allocation122_spill] sm:$0xff] %v3496_v32  ;;  %v3521_v32 = vld [vmem:[%s4764_s4 + $0x528] sm:$0xff] }
  0x78   :  { %4920 = vst [vmem:[#allocation123_spill] sm:$0xff] %v3501_v16  ;;  %v3526_v16 = vld [vmem:[%s4764_s4 + $0x530] sm:$0xff] }
  0x79   :  { %4921 = vst [vmem:[#allocation124_spill] sm:$0xff] %v3506_v0  ;;  %v3531_v0 = vld [vmem:[%s4764_s4 + $0x538] sm:$0xff] }
  0x7a   :  { %4922 = vst [vmem:[#allocation125_spill] sm:$0xff] %v3511_v49  ;;  %v3536_v49 = vld [vmem:[%s4764_s4 + $0x540] sm:$0xff] }
  0x7b   :  { %4923 = vst [vmem:[#allocation126_spill] sm:$0xff] %v3516_v48  ;;  %v3541_v48 = vld [vmem:[%s4764_s4 + $0x548] sm:$0xff] }
  0x7c   :  { %4924 = vst [vmem:[#allocation127_spill] sm:$0xff] %v3521_v32  ;;  %v3546_v32 = vld [vmem:[%s4764_s4 + $0x550] sm:$0xff] }
  0x7d   :  { %4925 = vst [vmem:[#allocation128_spill] sm:$0xff] %v3526_v16  ;;  %v3551_v16 = vld [vmem:[%s4764_s4 + $0x558] sm:$0xff] }
  0x7e   :  { %4926 = vst [vmem:[#allocation129_spill] sm:$0xff] %v3531_v0  ;;  %v3556_v0 = vld [vmem:[%s4764_s4 + $0x560] sm:$0xff] }
  0x7f   :  { %4927 = vst [vmem:[#allocation130_spill] sm:$0xff] %v3536_v49  ;;  %v3561_v49 = vld [vmem:[%s4764_s4 + $0x568] sm:$0xff] }
  0x80   :  { %4928 = vst [vmem:[#allocation131_spill] sm:$0xff] %v3541_v48  ;;  %v3566_v48 = vld [vmem:[%s4764_s4 + $0x570] sm:$0xff] }
  0x81   :  { %4929 = vst [vmem:[#allocation132_spill] sm:$0xff] %v3546_v32  ;;  %v3571_v32 = vld [vmem:[%s4764_s4 + $0x578] sm:$0xff] }
  0x82   :  { %4930 = vst [vmem:[#allocation133_spill] sm:$0xff] %v3551_v16  ;;  %v3576_v16 = vld [vmem:[%s4764_s4 + $0x580] sm:$0xff] }
  0x83   :  { %4931 = vst [vmem:[#allocation134_spill] sm:$0xff] %v3556_v0  ;;  %v3581_v0 = vld [vmem:[%s4764_s4 + $0x588] sm:$0xff] }
  0x84   :  { %4932 = vst [vmem:[#allocation135_spill] sm:$0xff] %v3561_v49  ;;  %v3586_v49 = vld [vmem:[%s4764_s4 + $0x590] sm:$0xff] }
  0x85   :  { %4933 = vst [vmem:[#allocation136_spill] sm:$0xff] %v3566_v48  ;;  %v3591_v48 = vld [vmem:[%s4764_s4 + $0x598] sm:$0xff] }
  0x86   :  { %4934 = vst [vmem:[#allocation137_spill] sm:$0xff] %v3571_v32  ;;  %v3596_v32 = vld [vmem:[%s4764_s4 + $0x5a0] sm:$0xff] }
  0x87   :  { %4935 = vst [vmem:[#allocation138_spill] sm:$0xff] %v3576_v16  ;;  %v3601_v16 = vld [vmem:[%s4764_s4 + $0x5a8] sm:$0xff] }
  0x88   :  { %4936 = vst [vmem:[#allocation139_spill] sm:$0xff] %v3581_v0  ;;  %v3606_v0 = vld [vmem:[%s4764_s4 + $0x5b0] sm:$0xff] }
  0x89   :  { %4937 = vst [vmem:[#allocation140_spill] sm:$0xff] %v3586_v49  ;;  %v3611_v49 = vld [vmem:[%s4764_s4 + $0x5b8] sm:$0xff] }
  0x8a   :  { %4938 = vst [vmem:[#allocation141_spill] sm:$0xff] %v3591_v48  ;;  %v3616_v48 = vld [vmem:[%s4764_s4 + $0x5c0] sm:$0xff] }
  0x8b   :  { %4939 = vst [vmem:[#allocation142_spill] sm:$0xff] %v3596_v32  ;;  %v3621_v32 = vld [vmem:[%s4764_s4 + $0x5c8] sm:$0xff] }
  0x8c   :  { %4940 = vst [vmem:[#allocation143_spill] sm:$0xff] %v3601_v16  ;;  %v3626_v16 = vld [vmem:[%s4764_s4 + $0x5d0] sm:$0xff] }
  0x8d   :  { %4941 = vst [vmem:[#allocation144_spill] sm:$0xff] %v3606_v0  ;;  %v3631_v0 = vld [vmem:[%s4764_s4 + $0x5d8] sm:$0xff] }
  0x8e   :  { %4942 = vst [vmem:[#allocation145_spill] sm:$0xff] %v3611_v49  ;;  %v3636_v49 = vld [vmem:[%s4764_s4 + $0x5e0] sm:$0xff] }
  0x8f   :  { %4943 = vst [vmem:[#allocation146_spill] sm:$0xff] %v3616_v48  ;;  %v3641_v48 = vld [vmem:[%s4764_s4 + $0x5e8] sm:$0xff] }
  0x90   :  { %4944 = vst [vmem:[#allocation147_spill] sm:$0xff] %v3621_v32  ;;  %v3646_v32 = vld [vmem:[%s4764_s4 + $0x5f0] sm:$0xff] }
  0x91   :  { %4945 = vst [vmem:[#allocation148_spill] sm:$0xff] %v3626_v16  ;;  %v3651_v16 = vld [vmem:[%s4764_s4 + $0x5f8] sm:$0xff] }
  0x92   :  { %4946 = vst [vmem:[#allocation149_spill] sm:$0xff] %v3631_v0  ;;  %v3656_v0 = vld [vmem:[%s4764_s4 + $0x600] sm:$0xff] }
  0x93   :  { %4947 = vst [vmem:[#allocation150_spill] sm:$0xff] %v3636_v49  ;;  %v3661_v49 = vld [vmem:[%s4764_s4 + $0x608] sm:$0xff] }
  0x94   :  { %4948 = vst [vmem:[#allocation151_spill] sm:$0xff] %v3641_v48  ;;  %v3666_v48 = vld [vmem:[%s4764_s4 + $0x610] sm:$0xff] }
  0x95   :  { %4949 = vst [vmem:[#allocation152_spill] sm:$0xff] %v3646_v32  ;;  %v3671_v32 = vld [vmem:[%s4764_s4 + $0x618] sm:$0xff] }
  0x96   :  { %4950 = vst [vmem:[#allocation153_spill] sm:$0xff] %v3651_v16  ;;  %v3676_v16 = vld [vmem:[%s4764_s4 + $0x620] sm:$0xff] }
  0x97   :  { %4951 = vst [vmem:[#allocation154_spill] sm:$0xff] %v3656_v0  ;;  %v3681_v0 = vld [vmem:[%s4764_s4 + $0x628] sm:$0xff] }
  0x98   :  { %4952 = vst [vmem:[#allocation155_spill] sm:$0xff] %v3661_v49  ;;  %v3686_v49 = vld [vmem:[%s4764_s4 + $0x630] sm:$0xff] }
  0x99   :  { %4953 = vst [vmem:[#allocation156_spill] sm:$0xff] %v3666_v48  ;;  %v3691_v48 = vld [vmem:[%s4764_s4 + $0x638] sm:$0xff] }
  0x9a   :  { %4954 = vst [vmem:[#allocation157_spill] sm:$0xff] %v3671_v32  ;;  %v3696_v32 = vld [vmem:[%s4764_s4 + $0x640] sm:$0xff] }
  0x9b   :  { %4955 = vst [vmem:[#allocation158_spill] sm:$0xff] %v3676_v16  ;;  %v3701_v16 = vld [vmem:[%s4764_s4 + $0x648] sm:$0xff] }
  0x9c   :  { %4956 = vst [vmem:[#allocation159_spill] sm:$0xff] %v3681_v0  ;;  %v3706_v0 = vld [vmem:[%s4764_s4 + $0x650] sm:$0xff] }
  0x9d   :  { %4957 = vst [vmem:[#allocation160_spill] sm:$0xff] %v3686_v49  ;;  %v3711_v49 = vld [vmem:[%s4764_s4 + $0x658] sm:$0xff] }
  0x9e   :  { %4958 = vst [vmem:[#allocation161_spill] sm:$0xff] %v3691_v48  ;;  %v3716_v48 = vld [vmem:[%s4764_s4 + $0x660] sm:$0xff] }
  0x9f   :  { %4959 = vst [vmem:[#allocation162_spill] sm:$0xff] %v3696_v32  ;;  %v3721_v32 = vld [vmem:[%s4764_s4 + $0x668] sm:$0xff] }
  0xa0   :  { %4960 = vst [vmem:[#allocation163_spill] sm:$0xff] %v3701_v16  ;;  %v3726_v16 = vld [vmem:[%s4764_s4 + $0x670] sm:$0xff] }
  0xa1   :  { %4961 = vst [vmem:[#allocation164_spill] sm:$0xff] %v3706_v0  ;;  %v3731_v0 = vld [vmem:[%s4764_s4 + $0x678] sm:$0xff] }
  0xa2   :  { %4962 = vst [vmem:[#allocation165_spill] sm:$0xff] %v3711_v49  ;;  %v3736_v49 = vld [vmem:[%s4764_s4 + $0x680] sm:$0xff] }
  0xa3   :  { %4963 = vst [vmem:[#allocation166_spill] sm:$0xff] %v3716_v48  ;;  %v3741_v48 = vld [vmem:[%s4764_s4 + $0x688] sm:$0xff] }
  0xa4   :  { %4964 = vst [vmem:[#allocation167_spill] sm:$0xff] %v3721_v32  ;;  %v3746_v32 = vld [vmem:[%s4764_s4 + $0x690] sm:$0xff] }
  0xa5   :  { %4965 = vst [vmem:[#allocation168_spill] sm:$0xff] %v3726_v16  ;;  %v3751_v16 = vld [vmem:[%s4764_s4 + $0x698] sm:$0xff] }
  0xa6   :  { %4966 = vst [vmem:[#allocation169_spill] sm:$0xff] %v3731_v0  ;;  %v3756_v0 = vld [vmem:[%s4764_s4 + $0x6a0] sm:$0xff] }
  0xa7   :  { %4967 = vst [vmem:[#allocation170_spill] sm:$0xff] %v3736_v49  ;;  %v3761_v49 = vld [vmem:[%s4764_s4 + $0x6a8] sm:$0xff] }
  0xa8   :  { %4968 = vst [vmem:[#allocation171_spill] sm:$0xff] %v3741_v48  ;;  %v3766_v48 = vld [vmem:[%s4764_s4 + $0x6b0] sm:$0xff] }
  0xa9   :  { %4969 = vst [vmem:[#allocation172_spill] sm:$0xff] %v3746_v32  ;;  %v3771_v32 = vld [vmem:[%s4764_s4 + $0x6b8] sm:$0xff] }
  0xaa   :  { %4970 = vst [vmem:[#allocation173_spill] sm:$0xff] %v3751_v16  ;;  %v3776_v16 = vld [vmem:[%s4764_s4 + $0x6c0] sm:$0xff] }
  0xab   :  { %4971 = vst [vmem:[#allocation174_spill] sm:$0xff] %v3756_v0  ;;  %v3781_v0 = vld [vmem:[%s4764_s4 + $0x6c8] sm:$0xff] }
  0xac   :  { %4972 = vst [vmem:[#allocation175_spill] sm:$0xff] %v3761_v49  ;;  %v3786_v49 = vld [vmem:[%s4764_s4 + $0x6d0] sm:$0xff] }
  0xad   :  { %4973 = vst [vmem:[#allocation176_spill] sm:$0xff] %v3766_v48  ;;  %v3791_v48 = vld [vmem:[%s4764_s4 + $0x6d8] sm:$0xff] }
  0xae   :  { %4974 = vst [vmem:[#allocation177_spill] sm:$0xff] %v3771_v32  ;;  %v3796_v32 = vld [vmem:[%s4764_s4 + $0x6e0] sm:$0xff] }
  0xaf   :  { %4975 = vst [vmem:[#allocation178_spill] sm:$0xff] %v3776_v16  ;;  %v3801_v16 = vld [vmem:[%s4764_s4 + $0x6e8] sm:$0xff] }
  0xb0   :  { %4976 = vst [vmem:[#allocation179_spill] sm:$0xff] %v3781_v0  ;;  %v3806_v0 = vld [vmem:[%s4764_s4 + $0x6f0] sm:$0xff] }
  0xb1   :  { %4977 = vst [vmem:[#allocation180_spill] sm:$0xff] %v3786_v49  ;;  %v3811_v49 = vld [vmem:[%s4764_s4 + $0x6f8] sm:$0xff] }
  0xb2   :  { %4978 = vst [vmem:[#allocation181_spill] sm:$0xff] %v3791_v48  ;;  %v3816_v48 = vld [vmem:[%s4764_s4 + $0x700] sm:$0xff] }
  0xb3   :  { %4979 = vst [vmem:[#allocation182_spill] sm:$0xff] %v3796_v32  ;;  %v3821_v32 = vld [vmem:[%s4764_s4 + $0x708] sm:$0xff] }
  0xb4   :  { %4980 = vst [vmem:[#allocation183_spill] sm:$0xff] %v3801_v16  ;;  %v3826_v16 = vld [vmem:[%s4764_s4 + $0x710] sm:$0xff] }
  0xb5   :  { %4981 = vst [vmem:[#allocation184_spill] sm:$0xff] %v3806_v0  ;;  %v3831_v0 = vld [vmem:[%s4764_s4 + $0x718] sm:$0xff] }
  0xb6   :  { %4982 = vst [vmem:[#allocation185_spill] sm:$0xff] %v3811_v49  ;;  %v3836_v49 = vld [vmem:[%s4764_s4 + $0x720] sm:$0xff] }
  0xb7   :  { %4983 = vst [vmem:[#allocation186_spill] sm:$0xff] %v3816_v48  ;;  %v3841_v48 = vld [vmem:[%s4764_s4 + $0x728] sm:$0xff] }
  0xb8   :  { %4984 = vst [vmem:[#allocation187_spill] sm:$0xff] %v3821_v32  ;;  %v3846_v32 = vld [vmem:[%s4764_s4 + $0x730] sm:$0xff] }
  0xb9   :  { %4985 = vst [vmem:[#allocation188_spill] sm:$0xff] %v3826_v16  ;;  %v3851_v16 = vld [vmem:[%s4764_s4 + $0x738] sm:$0xff] }
  0xba   :  { %4986 = vst [vmem:[#allocation189_spill] sm:$0xff] %v3831_v0  ;;  %v3856_v0 = vld [vmem:[%s4764_s4 + $0x740] sm:$0xff] }
  0xbb   :  { %4987 = vst [vmem:[#allocation190_spill] sm:$0xff] %v3836_v49  ;;  %v3861_v49 = vld [vmem:[%s4764_s4 + $0x748] sm:$0xff] }
  0xbc   :  { %4988 = vst [vmem:[#allocation191_spill] sm:$0xff] %v3841_v48  ;;  %v3866_v48 = vld [vmem:[%s4764_s4 + $0x750] sm:$0xff] }
  0xbd   :  { %4989 = vst [vmem:[#allocation192_spill] sm:$0xff] %v3846_v32  ;;  %v3871_v32 = vld [vmem:[%s4764_s4 + $0x758] sm:$0xff] }
  0xbe   :  { %4990 = vst [vmem:[#allocation193_spill] sm:$0xff] %v3851_v16  ;;  %v3876_v16 = vld [vmem:[%s4764_s4 + $0x760] sm:$0xff] }
  0xbf   :  { %4991 = vst [vmem:[#allocation194_spill] sm:$0xff] %v3856_v0  ;;  %v3881_v0 = vld [vmem:[%s4764_s4 + $0x768] sm:$0xff] }
  0xc0   :  { %4992 = vst [vmem:[#allocation195_spill] sm:$0xff] %v3861_v49  ;;  %v3886_v49 = vld [vmem:[%s4764_s4 + $0x770] sm:$0xff] }
  0xc1   :  { %4993 = vst [vmem:[#allocation196_spill] sm:$0xff] %v3866_v48  ;;  %v3891_v48 = vld [vmem:[%s4764_s4 + $0x778] sm:$0xff] }
  0xc2   :  { %4994 = vst [vmem:[#allocation197_spill] sm:$0xff] %v3871_v32  ;;  %v3896_v32 = vld [vmem:[%s4764_s4 + $0x780] sm:$0xff] }
  0xc3   :  { %4995 = vst [vmem:[#allocation198_spill] sm:$0xff] %v3876_v16  ;;  %v3901_v16 = vld [vmem:[%s4764_s4 + $0x788] sm:$0xff] }
  0xc4   :  { %4996 = vst [vmem:[#allocation199_spill] sm:$0xff] %v3881_v0  ;;  %v3906_v0 = vld [vmem:[%s4764_s4 + $0x790] sm:$0xff] }
  0xc5   :  { %4997 = vst [vmem:[#allocation200_spill] sm:$0xff] %v3886_v49  ;;  %v3911_v49 = vld [vmem:[%s4764_s4 + $0x798] sm:$0xff] }
  0xc6   :  { %4998 = vst [vmem:[#allocation201_spill] sm:$0xff] %v3891_v48  ;;  %v3916_v48 = vld [vmem:[%s4764_s4 + $0x7a0] sm:$0xff] }
  0xc7   :  { %4999 = vst [vmem:[#allocation202_spill] sm:$0xff] %v3896_v32  ;;  %v3921_v32 = vld [vmem:[%s4764_s4 + $0x7a8] sm:$0xff] }
  0xc8   :  { %5000 = vst [vmem:[#allocation203_spill] sm:$0xff] %v3901_v16  ;;  %v3926_v16 = vld [vmem:[%s4764_s4 + $0x7b0] sm:$0xff] }
  0xc9   :  { %5001 = vst [vmem:[#allocation204_spill] sm:$0xff] %v3906_v0  ;;  %v3931_v0 = vld [vmem:[%s4764_s4 + $0x7b8] sm:$0xff] }
  0xca   :  { %5002 = vst [vmem:[#allocation205_spill] sm:$0xff] %v3911_v49  ;;  %v3936_v49 = vld [vmem:[%s4764_s4 + $0x7c0] sm:$0xff] }
  0xcb   :  { %5003 = vst [vmem:[#allocation206_spill] sm:$0xff] %v3916_v48  ;;  %v3941_v48 = vld [vmem:[%s4764_s4 + $0x7c8] sm:$0xff] }
  0xcc   :  { %5004 = vst [vmem:[#allocation207_spill] sm:$0xff] %v3921_v32  ;;  %v3946_v32 = vld [vmem:[%s4764_s4 + $0x7d0] sm:$0xff] }
  0xcd   :  { %5005 = vst [vmem:[#allocation208_spill] sm:$0xff] %v3926_v16  ;;  %v3951_v16 = vld [vmem:[%s4764_s4 + $0x7d8] sm:$0xff] }
  0xce   :  { %5006 = vst [vmem:[#allocation209_spill] sm:$0xff] %v3931_v0  ;;  %v3956_v0 = vld [vmem:[%s4764_s4 + $0x7e0] sm:$0xff] }
  0xcf   :  { %5007 = vst [vmem:[#allocation210_spill] sm:$0xff] %v3936_v49  ;;  %v3961_v49 = vld [vmem:[%s4764_s4 + $0x7e8] sm:$0xff] }
  0xd0   :  { %5008 = vst [vmem:[#allocation211_spill] sm:$0xff] %v3941_v48  ;;  %v3966_v48 = vld [vmem:[%s4764_s4 + $0x7f0] sm:$0xff] }
  0xd1   :  { %5009 = vst [vmem:[#allocation212_spill] sm:$0xff] %v3946_v32  ;;  %v3971_v32 = vld [vmem:[%s4764_s4 + $0x7f8] sm:$0xff] }
  0xd2   :  { %5010 = vst [vmem:[#allocation213_spill] sm:$0xff] %v3951_v16  ;;  %v576_v16 = vld [vmem:[%s4760_s0] sm:$0xff] }
  0xd3   :  { %5011 = vst [vmem:[#allocation214_spill] sm:$0xff] %v3956_v0  ;;  %v577_v0 = vld [vmem:[%s4760_s0 + $0x8] sm:$0xff] }
  0xd4   :  { %5012 = vst [vmem:[#allocation215_spill] sm:$0xff] %v3961_v49  ;;  %v2610_v49 = vmov 0  }
  0xd5   :  { %5013 = vst [vmem:[#allocation216_spill] sm:$0xff] %v3966_v48  ;;  %2601 = vset.pattern.permute.xlu1 %v2610_v49  ;;  %v1069_v48 = vld [vmem:[%s4761_s1] sm:$0xff]  ;;  %2602 = vset.pattern.permute.xlu0 %v2610_v49 }
  0xd6   :  { %5014 = vst [vmem:[#allocation217_spill] sm:$0xff] %v3971_v32  ;;  %1072 = vperm.xlu1 %2601, %v1069_v48  }
  0xd7   :  { %580 = vst [vmem:[#allocation1] ss:$2 sm:$0xff] %v576_v16 }
  0xd8   :  { %584 = vst [vmem:[#allocation1 + $0x10] ss:$2 sm:$0xff] %v577_v0 }
  0xd9   :  { %575 = vsyncadd [#allocation3], 32768  ;;  %vm591_vm0 = vcmask 1043456   ;;  %v611_v32 = vld [vmem:[%s4762_s2] sm:$0xff]  ;;  %v612_v33 = vld [vmem:[%s4762_s2 + $0x8] sm:$0xff]  ;;  %vm661_vm2 = vcmask 1041409  }
  0xda   :  { %v1070_v16 = vld [vmem:[%s4761_s1 + $0x8] sm:$0xff]  ;;  %v614_v35 = vld [vmem:[%s4762_s2 + $0x18] sm:$0xff]  ;;  %vm698_vm3 = vcmask 31744   ;;  %vm1091_vm5 = vcmask 523264   ;;  %vm1142_vm7 = vcmask 261120  }
  0xdb   :  { %677 = vst [vmem:[#allocation1 + $0x30] ss:$2 sm:$0xff] %v614_v35  ;;  %v613_v35 = vld [vmem:[%s4762_s2 + $0x10] sm:$0xff] }
  0xdc   :  { %675 = vst [vmem:[#allocation1 + $0x20] ss:$2 sm:$0xff] %v613_v35  ;;  %v657_v35 = vlaneseq }
  0xde   :  { %v581_v17 = vld.sshfl [vmem:[#allocation1] sm:$0xff pattern:$0x75316420]  ;;  %v582_v1 = vld.sshfl [vmem:[#allocation1 + $0x8] sm:$0xff pattern:$0x75316420]  ;;  %1075 = vperm.xlu1 %2601, %v1070_v16  }
  0xdf   :  { %v592_v49 = vsel %vm591_vm0, %v581_v17, 0.0  ;;  %v593_v0 = vsel %vm591_vm0, %v582_v1, 0.0  ;;  %671 = vst [vmem:[#allocation1] ss:$2 sm:$0xff] %v611_v32  ;;  %v2611_v17 = vmov 256.0  }
  0xe0   :  { %v594_v48 = vadd.f32 %v593_v0, %v592_v49  ;;  %v585_v50 = vld.sshfl [vmem:[#allocation1 + $0x10] sm:$0xff pattern:$0x75316420]  ;;  %v586_v34 = vld.sshfl [vmem:[#allocation1 + $0x18] sm:$0xff pattern:$0x75316420]  ;;  %2604 = vrcp.f32 %v2611_v17 }
  0xe1   :  { %673 = vst [vmem:[#allocation1 + $0x10] ss:$2 sm:$0xff] %v612_v33  ;;  %v597_v18 = vsel %vm591_vm0, %v585_v50, 0.0  ;;  %v598_v2 = vsel %vm591_vm0, %v586_v34, 0.0  ;;  %v615_v33 = vld [vmem:[%s4762_s2 + $0x20] sm:$0xff] }
  0xe2   :  { %595 = vadd.xlane.f32.xlu0 %v594_v48  ;;  %v599_v51 = vadd.f32 %v598_v2, %v597_v18  ;;  %v616_v2 = vld [vmem:[%s4762_s2 + $0x28] sm:$0xff]  ;;  %v685_v18 = vld.sshfl [vmem:[#allocation1 + $0x38] sm:$0xff pattern:$0x75316420]  ;;  %v617_v48 = vld [vmem:[%s4762_s2 + $0x30] sm:$0xff] }
  0xe3   :  { %2544 = vmatpush.msk.msra.mxu3 %vm591_vm0, %v685_v18  ;;  %v684_v16 = vld.sshfl [vmem:[#allocation1 + $0x30] sm:$0xff pattern:$0x75316420]  ;;  %v682_v17 = vld.sshfl [vmem:[#allocation1 + $0x20] sm:$0xff pattern:$0x75316420] }
  0xe6   :  { %v678_v1 = vld.sshfl [vmem:[#allocation1] sm:$0xff pattern:$0x75316420]  ;;  %v679_v32 = vld.sshfl [vmem:[#allocation1 + $0x8] sm:$0xff pattern:$0x75316420]  ;;  %v2605_v49 = vpop.eup %2604 }
  0xe7   :  { %2530 = vmatpush.msk.msra.mxu0 %vm591_vm0, %v678_v1  ;;  %2532 = vmatpush.msk.msra.mxu1 %vm591_vm0, %v679_v32  ;;  %686 = vst [vmem:[#allocation1] ss:$2 sm:$0xff] %v615_v33  ;;  %v603_v0 = vmul.f32 256.0, %v2605_v49  ;;  %v683_v1 = vld.sshfl [vmem:[#allocation1 + $0x28] sm:$0xff pattern:$0x75316420]  ;;  %vm607_vm1 = vweird.f32 %v2605_v49 }
  0xe8   :  { %v680_v34 = vld.sshfl [vmem:[#allocation1 + $0x10] sm:$0xff pattern:$0x75316420]  ;;  %v681_v50 = vld.sshfl [vmem:[#allocation1 + $0x18] sm:$0xff pattern:$0x75316420] }
  0xe9   :  { %2534 = vmatpush.msk.msra.mxu2 %vm591_vm0, %v680_v34  ;;  %687 = vst [vmem:[#allocation1 + $0x10] ss:$2 sm:$0xff] %v616_v2  ;;  %2536 = vmatpush.msk.msrb.mxu0 %vm591_vm0, %v681_v50  ;;  %v604_v33 = vsub.f32 1.0, %v603_v0 }
  0xea   :  { %600 = vadd.xlane.f32.xlu0 %v599_v51  ;;  %v618_v51 = vld [vmem:[%s4762_s2 + $0x38] sm:$0xff]  ;;  %688 = vst [vmem:[#allocation1 + $0x20] ss:$2 sm:$0xff] %v617_v48  ;;  %2540 = vmatpush.msk.msrb.mxu1 %vm591_vm0, %v683_v1 }
  0xeb   :  { %689 = vst [vmem:[#allocation1 + $0x30] ss:$2 sm:$0xff] %v618_v51  ;;  %2542 = vmatpush.msk.msrb.mxu2 %vm591_vm0, %v684_v16  ;;  %v605_v34 = vmul.f32 %v2605_v49, %v604_v33  ;;  %v4021_v51 = vand.u32 127, %v657_v35  ;;  %v1086_v35 = vld [vmem:[%s4766_s6 + $0x18] sm:$0xff] }
  0xed   :  { %v606_v2 = vadd.f32 %v2605_v49, %v605_v34  ;;  %v1089_v34 = vld [vmem:[%s4766_s6 + $0x30] sm:$0xff] }
  0xee   :  { %v691_v52 = vld.sshfl [vmem:[#allocation1 + $0x8] sm:$0xff pattern:$0x75316420] }
  0xef   :  { %v608_v50 = vsel %vm607_vm1, %v2605_v49, %v606_v2  ;;  %v1088_v2 = vld [vmem:[%s4766_s6 + $0x28] sm:$0xff] }
  0xf0   :  { %v693_v32 = vld.sshfl [vmem:[#allocation1 + $0x18] sm:$0xff pattern:$0x75316420] }
  0xf1   :  { %2552 = vmatpush.msk.msrb.mxu3 %vm591_vm0, %v693_v32  ;;  %v692_v32 = vld.sshfl [vmem:[#allocation1 + $0x10] sm:$0xff pattern:$0x75316420] }
  0xf2   :  { %v697_v33 = vld.sshfl [vmem:[#allocation1 + $0x38] sm:$0xff pattern:$0x75316420]  ;;  %v696_v49 = vld.sshfl [vmem:[#allocation1 + $0x30] sm:$0xff pattern:$0x75316420] }
 0x155   :  { %v596_v18 = vpop.xlane.xlu0 %595 }
 0x156   :  { %v609_v16 = vmul.f32 %v608_v50, %v596_v18  ;;  %v1087_v18 = vld [vmem:[%s4766_s6 + $0x20] sm:$0xff] }
 0x158   :  { %v659_v48 = vperm.slane %v609_v16, %v4021_v51  ;;  %v1085_v16 = vld [vmem:[%s4766_s6 + $0x10] sm:$0xff] }
 0x15d   :  { %v601_v19 = vpop.xlane.xlu0 %600 }
 0x15e   :  { %v610_v3 = vmul.f32 %v608_v50, %v601_v19  ;;  %v695_v19 = vld.sshfl [vmem:[#allocation1 + $0x28] sm:$0xff pattern:$0x75316420]  ;;  %v1073_v50 = vpop.permute.xlu1 %1072 }
 0x15f   :  { %vm1077_vm4 = vcmp.eq.s32.totalorder %v4021_v51, %v1073_v50  ;;  %v4130_v50 = vld [vmem:[%s4768_s8 + $0x18] sm:$0xff] }
 0x160   :  { %v660_v1 = vperm.slane %v610_v3, %v4021_v51  ;;  %v690_v3 = vld.sshfl [vmem:[#allocation1] sm:$0xff pattern:$0x75316420]  ;;  %5025 = vst [vmem:[#allocation228_spill] sm:$0xff] %v4130_v50 }
 0x162   :  { %v662_v0 = vsel %vm661_vm2, %v660_v1, %v659_v48  ;;  %v1084_v48 = vld [vmem:[%s4766_s6 + $0x8] sm:$0xff]  ;;  %v1083_v1 = vld [vmem:[%s4766_s6] sm:$0xff] }
 0x163   :  { %2531 = vmatmul.msk.f32.vlgmr.msra.gmra.mxu0 %vm698_vm3, %v662_v0  ;;  %2533 = vmatmul.msk.f32.vlgmr.msra.gmra.mxu1 %vm698_vm3, %v662_v0 }
 0x164   :  { %2535 = vmatmul.msk.f32.vlgmr.msra.gmra.mxu2 %vm698_vm3, %v662_v0  ;;  %2545 = vmatmul.msk.f32.vlgmr.msra.gmra.mxu3 %vm698_vm3, %v662_v0 }
 0x165   :  { %2538 = vmatpush.msk.msra.mxu0 %vm591_vm0, %v682_v17  ;;  %2548 = vmatpush.msk.msra.mxu1 %vm591_vm0, %v691_v52  ;;  %v694_v52 = vld.sshfl [vmem:[#allocation1 + $0x20] sm:$0xff pattern:$0x75316420]  ;;  %v1090_v17 = vld [vmem:[%s4766_s6 + $0x38] sm:$0xff] }
 0x166   :  { %2550 = vmatpush.msk.msra.mxu2 %vm591_vm0, %v692_v32  ;;  %2560 = vmatpush.msk.msra.mxu3 %vm591_vm0, %v697_v33  ;;  %v4776_v32 = vmov 0.0  }
 0x167   :  { %v2562_v33 = vsel %vm1077_vm4, 1.0, %v4776_v32 }
 0x16b   :  { %2537 = vmatmul.msk.f32.vlgmr.msrb.gmra.mxu0 %vm698_vm3, %v662_v0  ;;  %2541 = vmatmul.msk.f32.vlgmr.msrb.gmra.mxu1 %vm698_vm3, %v662_v0 }
 0x16c   :  { %2543 = vmatmul.msk.f32.vlgmr.msrb.gmra.mxu2 %vm698_vm3, %v662_v0  ;;  %2553 = vmatmul.msk.f32.vlgmr.msrb.gmra.mxu3 %vm698_vm3, %v662_v0 }
 0x16d   :  { %2546 = vmatpush.msk.msrb.mxu0 %vm591_vm0, %v690_v3  ;;  %2556 = vmatpush.msk.msrb.mxu1 %vm591_vm0, %v695_v19  ;;  %v619_v19 = vld [vmem:[%s4763_s3] sm:$0xff] }
 0x16e   :  { %2558 = vmatpush.msk.msrb.mxu2 %vm591_vm0, %v696_v49  ;;  %v623_v49 = vperm.slane %v619_v19, 0  ;;  %1455 = vmatpush.msrb.mxu3 %v2851_v31 }
 0x173   :  { %2539 = vmatmul.msk.f32.vlgmr.msra.gmra.mxu0 %vm698_vm3, %v662_v0  ;;  %2549 = vmatmul.msk.f32.vlgmr.msra.gmra.mxu1 %vm698_vm3, %v662_v0 }
 0x174   :  { %2551 = vmatmul.msk.f32.vlgmr.msra.gmra.mxu2 %vm698_vm3, %v662_v0  ;;  %2561 = vmatmul.msk.f32.vlgmr.msra.gmra.mxu3 %vm698_vm3, %v662_v0 }
 0x175   :  { %2554 = vmatpush.msk.msra.mxu0 %vm591_vm0, %v694_v52  ;;  %v624_v52 = vperm.slane %v619_v19, 1  ;;  %1435 = vmatpush.msra.mxu2 %v2771_v15 }
 0x17b   :  { %2547 = vmatmul.msk.f32.vlgmr.msrb.gmra.mxu0 %vm698_vm3, %v662_v0  ;;  %2557 = vmatmul.msk.f32.vlgmr.msrb.gmra.mxu1 %vm698_vm3, %v662_v0 }
 0x17c   :  { %2559 = vmatmul.msk.f32.vlgmr.msrb.gmra.mxu2 %vm698_vm3, %v662_v0  ;;  %1106 = vmatpush.msrb.mxu0 %v1090_v17 }
 0x17e   :  { %1107 = vmatpush.msrb.mxu0 %v1089_v34 }
 0x180   :  { %1108 = vmatpush.msrb.mxu0 %v1088_v2 }
 0x182   :  { %1109 = vmatpush.msrb.mxu0 %v1087_v18 }
 0x183   :  { %2555 = vmatmul.msk.f32.vlgmr.msra.gmra.mxu0 %vm698_vm3, %v662_v0  ;;  %v1076_v0 = vpop.permute.xlu1 %1075 }
 0x184   :  { %1110 = vmatpush.msrb.mxu0 %v1086_v35  ;;  %vm1078_vm6 = vcmp.eq.s32.totalorder %v4021_v51, %v1076_v0  ;;  %v4087_v35 = vld [vmem:[%s4767_s7 + $0x18] sm:$0xff]  ;;  %v630_v0 = vperm.slane %v619_v19, 7  ;;  %v4135_v51 = vld [vmem:[%s4771_s11] sm:$0xff] }
 0x185   :  { %v2563_v3 = vsel %vm1078_vm6, 1.0, %v4776_v32  ;;  %5017 = vst [vmem:[#allocation220_spill] sm:$0xff] %v4087_v35  ;;  %1161 = vmatpush.msra.mxu1 %v4087_v35  ;;  %v4125_v32 = vld [vmem:[%s4768_s8 + $0x10] sm:$0xff] }
 0x186   :  { %1111 = vmatpush.msrb.mxu0 %v1085_v16  ;;  %v4094_v16 = vld [vmem:[%s4770_s10] sm:$0xff]  ;;  %5024 = vst [vmem:[#allocation227_spill] sm:$0xff] %v4125_v32 }
 0x187   :  { %5018 = vst [vmem:[#allocation221_spill] sm:$0xff] %v4094_v16  ;;  %v4140_v16 = vld [vmem:[%s4771_s11 + $0x8] sm:$0xff] }
 0x188   :  { %1112 = vmatpush.msrb.mxu0 %v1084_v48  ;;  %v4099_v48 = vld [vmem:[%s4770_s10 + $0x8] sm:$0xff]  ;;  %5026 = vst [vmem:[#allocation229_spill] sm:$0xff] %v4135_v51  ;;  %v4155_v51 = vld [vmem:[%s4772_s12] sm:$0x1] }
 0x189   :  { %5019 = vst [vmem:[#allocation222_spill] sm:$0xff] %v4099_v48  ;;  %v4145_v48 = vld [vmem:[%s4771_s11 + $0x10] sm:$0xff] }
 0x18a   :  { %1113 = vmatpush.msrb.mxu0 %v1083_v1  ;;  %v4104_v1 = vld [vmem:[%s4770_s10 + $0x10] sm:$0xff]  ;;  %5027 = vst [vmem:[#allocation230_spill] sm:$0xff] %v4140_v16 }
 0x18b   :  { %2564 = vmatmul.msk.f32.vlgmr.msrb.gmra.mxu0 %vm1091_vm5, %v2562_v33  ;;  %5020 = vst [vmem:[#allocation223_spill] sm:$0xff] %v4104_v1  ;;  %v625_v33 = vperm.slane %v619_v19, 2  ;;  %v4150_v1 = vld [vmem:[%s4771_s11 + $0x18] sm:$0xff]  ;;  %v4160_v16 = vld [vmem:[%s4767_s7 + $0x10] sm:$0xff] }
 0x18c   :  { %5028 = vst [vmem:[#allocation231_spill] sm:$0xff] %v4145_v48  ;;  %v4165_v48 = vld [vmem:[%s4767_s7 + $0x8] sm:$0xff]  ;;  %1162 = vmatpush.msra.mxu1 %v4160_v16 }
 0x18d   :  { %5029 = vst [vmem:[#allocation232_spill] sm:$0xff] %v4150_v1 }
 0x18e   :  { %5030 = vst [vmem:[#allocation233_spill] sm:$0xff] %v4155_v51  ;;  %1163 = vmatpush.msra.mxu1 %v4165_v48 }
 0x18f   :  { %5031 = vst [vmem:[#allocation234_spill] sm:$0xff] %v4160_v16 }
 0x190   :  { %5032 = vst [vmem:[#allocation235_spill] sm:$0xff] %v4165_v48 }
 0x193   :  { %2565 = vmatmul.msk.f32.gmra.mxu0 %vm1091_vm5, %v2563_v3  ;;  %v4110_v3 = vld [vmem:[%s4770_s10 + $0x18] sm:$0xff] }
 0x194   :  { %5021 = vst [vmem:[#allocation224_spill] sm:$0xff] %v4110_v3 }
 0x1e0   :  { %v750_v17 = vpop.f32.mrf.mxu0  ;;  %v770_v34 = vpop.f32.mrf.mxu1 }
 0x1e1   :  { %v4080_v2 = vadd.f32 %v750_v17, %v623_v49  ;;  %v4082_v18 = vadd.f32 %v770_v34, %v624_v52  ;;  %v4115_v49 = vld [vmem:[%s4768_s8] sm:$0xff]  ;;  %v4120_v52 = vld [vmem:[%s4768_s8 + $0x8] sm:$0xff]  ;;  %v626_v17 = vperm.slane %v619_v19, 3  ;;  %v628_v34 = vperm.slane %v619_v19, 5 }
 0x1e2   :  { %5022 = vst [vmem:[#allocation225_spill] sm:$0xff] %v4115_v49 }
 0x1e3   :  { %5015 = vst [vmem:[#allocation218_spill] sm:$0xff] %v4080_v2  ;;  %v4182_v2 = vld [vmem:[%s4767_s7] sm:$0xff] }
 0x1e4   :  { %5016 = vst [vmem:[#allocation219_spill] sm:$0xff] %v4082_v18  ;;  %v620_v18 = vld [vmem:[%s4763_s3 + $0x8] sm:$0xff]  ;;  %1164 = vmatpush.msra.mxu1 %v4182_v2 }
 0x1e5   :  { %5023 = vst [vmem:[#allocation226_spill] sm:$0xff] %v4120_v52 }
 0x1e6   :  { %5037 = vst [vmem:[#allocation240_spill] sm:$0xff] %v4182_v2 }
 0x1e7   :  { %v790_v3 = vpop.f32.mrf.mxu2  ;;  %v890_v49 = vpop.f32.mrf.mxu3 }
 0x1e8   :  { %v4167_v52 = vadd.f32 %v790_v3, %v625_v33  ;;  %v4169_v1 = vadd.f32 %v890_v49, %v630_v0  ;;  %v810_v32 = vpop.f32.mrf.mxu0  ;;  %v850_v50 = vpop.f32.mrf.mxu1  ;;  %v629_v3 = vperm.slane %v619_v19, 6  ;;  %v634_v49 = vperm.slane %v620_v18, 3 }
 0x1e9   :  { %v4172_v35 = vadd.f32 %v810_v32, %v626_v17  ;;  %v4174_v51 = vadd.f32 %v850_v50, %v628_v34  ;;  %v627_v17 = vperm.slane %v619_v19, 4  ;;  %v632_v34 = vperm.slane %v620_v18, 1 }
 0x1ea   :  { %5033 = vst [vmem:[#allocation236_spill] sm:$0xff] %v4167_v52 }
 0x1eb   :  { %5034 = vst [vmem:[#allocation237_spill] sm:$0xff] %v4169_v1 }
 0x1ec   :  { %5035 = vst [vmem:[#allocation238_spill] sm:$0xff] %v4172_v35  ;;  %v633_v35 = vperm.slane %v620_v18, 2 }
 0x1ed   :  { %5036 = vst [vmem:[#allocation239_spill] sm:$0xff] %v4174_v51  ;;  %v638_v51 = vperm.slane %v620_v18, 7 }
 0x1ef   :  { %v870_v16 = vpop.f32.mrf.mxu2  ;;  %v970_v36 = vpop.f32.mrf.mxu3 }
 0x1f0   :  { %v4190_v20 = vadd.f32 %v870_v16, %v629_v3  ;;  %v4192_v4 = vadd.f32 %v970_v36, %v634_v49  ;;  %v830_v33 = vpop.f32.mrf.mxu0  ;;  %v930_v0 = vpop.f32.mrf.mxu1  ;;  %v631_v16 = vperm.slane %v620_v18, 0  ;;  %v636_v3 = vperm.slane %v620_v18, 5 }
 0x1f1   :  { %v4194_v1 = vadd.f32 %v830_v33, %v627_v17  ;;  %v4196_v48 = vadd.f32 %v930_v0, %v632_v34 }
 0x1f2   :  { %5038 = vst [vmem:[#allocation241_spill] sm:$0xff] %v4190_v20  ;;  %v635_v20 = vperm.slane %v620_v18, 4 }
 0x1f3   :  { %5039 = vst [vmem:[#allocation242_spill] sm:$0xff] %v4192_v4 }
 0x1f4   :  { %5040 = vst [vmem:[#allocation243_spill] sm:$0xff] %v4196_v48  ;;  %v637_v48 = vperm.slane %v620_v18, 6  ;;  %v4225_v18 = vld [vmem:[%s4769_s9] ss:$0 sm:$0xff] }
 0x1f7   :  { %v950_v36 = vpop.f32.mrf.mxu2  ;;  %v1050_v49 = vpop.f32.mrf.mxu3 }
 0x1f8   :  { %v4202_v52 = vadd.f32 %v950_v36, %v633_v35  ;;  %v4204_v33 = vadd.f32 %v1050_v49, %v638_v51  ;;  %v910_v0 = vpop.f32.mrf.mxu0  ;;  %v1010_v17 = vpop.f32.mrf.mxu1 }
 0x1f9   :  { %v4206_v34 = vadd.f32 %v910_v0, %v631_v16  ;;  %v4208_v32 = vadd.f32 %v1010_v17, %v636_v3 }
 0x1fa   :  { %v1063_v50 = vmax.f32 %v4202_v52, 0.0  ;;  %v1068_v19 = vmax.f32 %v4204_v33, 0.0 }
 0x1fb   :  { %v1061_v2 = vmax.f32 %v4206_v34, 0.0  ;;  %v1066_v4 = vmax.f32 %v4208_v32, 0.0 }
 0x1ff   :  { %v1030_v35 = vpop.f32.mrf.mxu2 }
 0x200   :  { %v4214_v36 = vadd.f32 %v1030_v35, %v637_v48  ;;  %v990_v51 = vpop.f32.mrf.mxu0 }
 0x201   :  { %v4216_v49 = vadd.f32 %v990_v51, %v635_v20 }
 0x202   :  { %v1067_v16 = vmax.f32 %v4214_v36, 0.0 }
 0x203   :  { %v1065_v3 = vmax.f32 %v4216_v49, 0.0 }
 0x208   :  { %v1115_v0 = vpop.f32.mrf.mxu0 }
 0x209   :  { %2566 = vmatmul.msk.f32.vlgmr.msra.gmra.mxu1 %vm1142_vm7, %v1115_v0 }
 0x210   :  { %v1118_v17 = vpop.f32.mrf.mxu0 }
 0x211   :  { %2567 = vmatmul.msk.f32.gmra.mxu1 %vm1142_vm7, %v1118_v17 }
 0x286   :  { %v1166_v48 = vpop.f32.mrf.mxu1 }
 0x287   :  { %v4228_v20 = vadd.f32 %v4225_v18, %v1166_v48 }
 0x28e   :  { %v1169_v35 = vpop.f32.mrf.mxu1 }
 0x28f   :  { %v4231_v51 = vadd.f32 %v4225_v18, %v1169_v35 }
 0x290   :  { %2608 = dma.done.wait [#allocation3], 32768 }
 0x291   :  { %2609 = vsyncadd [#allocation3], 4294934528  ;;  %1475 = vmatpush.msrb.mxu1 %v2931_v47  ;;  %1495 = vmatpush.msra.mxu0 %v3011_v63  ;;  %v5051_v15 = vld [vmem:[#allocation18_spill] sm:$0xff]  ;;  %v5062_v31 = vld [vmem:[#allocation21_spill] sm:$0xff]  ;;  %vm2449_vm8 = vcmask 1040384   ;;  %vm2451_vm9 = vcmask 1041408  }
 0x292   :  { %1436 = vmatpush.msra.mxu2 %v2766_v14  ;;  %1456 = vmatpush.msrb.mxu3 %v2846_v30  ;;  %v5050_v14 = vld [vmem:[#allocation13_spill] sm:$0xff]  ;;  %v5061_v30 = vld [vmem:[#allocation16_spill] sm:$0xff]  ;;  %v5073_v47 = vld [vmem:[#allocation71_spill] sm:$0xff]  ;;  %vm2453_vm10 = vcmask 1042432   ;;  %vm2456_vm11 = vcmask 1044480   ;;  %vm2458_vm12 = vcmask 1045504  }
 0x293   :  { %1476 = vmatpush.msrb.mxu1 %v2926_v46  ;;  %1496 = vmatpush.msra.mxu0 %v3006_v62  ;;  %v5072_v46 = vld [vmem:[#allocation54_spill] sm:$0xff]  ;;  %v5083_v62 = vld [vmem:[#allocation35_spill] sm:$0xff]  ;;  %v5085_v0 = vld [vmem:[#allocation68_spill] sm:$0xff]  ;;  %vm2460_vm13 = vcmask 1046528  }
 0x294   :  { %1437 = vmatpush.msra.mxu2 %v2761_v13  ;;  %1457 = vmatpush.msrb.mxu3 %v2841_v29  ;;  %v5049_v13 = vld [vmem:[#allocation8_spill] sm:$0xff]  ;;  %v5060_v29 = vld [vmem:[#allocation57_spill] sm:$0xff]  ;;  %v5084_v63 = vld [vmem:[#allocation51_spill] sm:$0xff] }
 0x295   :  { %1477 = vmatpush.msrb.mxu1 %v2921_v45  ;;  %1497 = vmatpush.msra.mxu0 %v3001_v61  ;;  %v5071_v45 = vld [vmem:[#allocation38_spill] sm:$0xff]  ;;  %v5082_v61 = vld [vmem:[#allocation85_spill] sm:$0xff]  ;;  %v5086_v17 = vld [vmem:[#allocation84_spill] sm:$0xff] }
 0x296   :  { %1438 = vmatpush.msra.mxu2 %v2756_v12  ;;  %1458 = vmatpush.msrb.mxu3 %v2836_v28  ;;  %v5047_v12 = vld [vmem:[#allocation19_spill] sm:$0xff]  ;;  %v5059_v28 = vld [vmem:[#allocation41_spill] sm:$0xff]  ;;  %v5087_v48 = vld [vmem:[#allocation34_spill] sm:$0xff] }
 0x297   :  { %1478 = vmatpush.msrb.mxu1 %v2916_v44  ;;  %1498 = vmatpush.msra.mxu0 %v2996_v60  ;;  %v5070_v44 = vld [vmem:[#allocation88_spill] sm:$0xff]  ;;  %v5081_v60 = vld [vmem:[#allocation69_spill] sm:$0xff]  ;;  %v5088_v35 = vld [vmem:[#allocation50_spill] sm:$0xff] }
 0x298   :  { %1439 = vmatpush.msra.mxu2 %v2751_v11  ;;  %1459 = vmatpush.msrb.mxu3 %v2831_v27  ;;  %v5046_v11 = vld [vmem:[#allocation14_spill] sm:$0xff]  ;;  %v5058_v27 = vld [vmem:[#allocation11_spill] sm:$0xff]  ;;  %v5203_v34 = vld [vmem:[#allocation184_spill] sm:$0xff] }
 0x299   :  { %1479 = vmatpush.msrb.mxu1 %v2911_v43  ;;  %1499 = vmatpush.msra.mxu0 %v2991_v59  ;;  %v5069_v43 = vld [vmem:[#allocation72_spill] sm:$0xff]  ;;  %v5224_v52 = vld [vmem:[#allocation162_spill] sm:$0xff]  ;;  %v5272_v32 = vld [vmem:[#allocation187_spill] sm:$0xff] }
 0x29a   :  { %1440 = vmatpush.msra.mxu2 %v2746_v10  ;;  %1460 = vmatpush.msrb.mxu3 %v2826_v26  ;;  %v5045_v10 = vld [vmem:[#allocation9_spill] sm:$0xff]  ;;  %v5057_v26 = vld [vmem:[#allocation6_spill] sm:$0xff]  ;;  %v5080_v59 = vld [vmem:[#allocation52_spill] sm:$0xff] }
 0x29b   :  { %1480 = vmatpush.msrb.mxu1 %v2906_v42  ;;  %1500 = vmatpush.msra.mxu0 %v2986_v58  ;;  %v5068_v42 = vld [vmem:[#allocation55_spill] sm:$0xff]  ;;  %v5079_v58 = vld [vmem:[#allocation36_spill] sm:$0xff]  ;;  %v5285_v33 = vld [vmem:[#allocation222_spill] sm:$0xff] }
 0x29c   :  { %1441 = vmatpush.msra.mxu2 %v2741_v9  ;;  %1461 = vmatpush.msrb.mxu3 %v2821_v25  ;;  %v5043_v9 = vld [vmem:[#allocation20_spill] sm:$0xff]  ;;  %v5056_v25 = vld [vmem:[#allocation22_spill] sm:$0xff]  ;;  %v5283_v36 = vld [vmem:[#allocation223_spill] sm:$0xff] }
 0x29d   :  { %1481 = vmatpush.msrb.mxu1 %v2901_v41  ;;  %1501 = vmatpush.msra.mxu0 %v2981_v57  ;;  %v5067_v41 = vld [vmem:[#allocation39_spill] sm:$0xff]  ;;  %v5078_v57 = vld [vmem:[#allocation86_spill] sm:$0xff]  ;;  %v5268_v49 = vld [vmem:[#allocation188_spill] sm:$0xff] }
 0x29e   :  { %1442 = vmatpush.msra.mxu2 %v2736_v8  ;;  %1462 = vmatpush.msrb.mxu3 %v2816_v24  ;;  %v5042_v8 = vld [vmem:[#allocation15_spill] sm:$0xff]  ;;  %v5055_v24 = vld [vmem:[#allocation17_spill] sm:$0xff] }
 0x29f   :  { %1482 = vmatpush.msrb.mxu1 %v2896_v40  ;;  %1502 = vmatpush.msra.mxu0 %v2976_v56  ;;  %v5066_v40 = vld [vmem:[#allocation89_spill] sm:$0xff]  ;;  %v5077_v56 = vld [vmem:[#allocation70_spill] sm:$0xff] }
 0x2a0   :  { %1443 = vmatpush.msra.mxu2 %v2731_v7  ;;  %1463 = vmatpush.msrb.mxu3 %v2811_v23  ;;  %v5041_v7 = vld [vmem:[#allocation10_spill] sm:$0xff]  ;;  %v5054_v23 = vld [vmem:[#allocation12_spill] sm:$0xff] }
 0x2a1   :  { %1483 = vmatpush.msrb.mxu1 %v2891_v39  ;;  %1503 = vmatpush.msra.mxu0 %v2971_v55  ;;  %v5065_v39 = vld [vmem:[#allocation73_spill] sm:$0xff] }
 0x2a2   :  { %1444 = vmatpush.msra.mxu2 %v2726_v6  ;;  %1464 = vmatpush.msrb.mxu3 %v2806_v22  ;;  %v5044_v6 = vld [vmem:[#allocation25_spill] sm:$0xff]  ;;  %v5053_v22 = vld [vmem:[#allocation7_spill] sm:$0xff] }
 0x2a3   :  { %1484 = vmatpush.msrb.mxu1 %v2886_v38  ;;  %1504 = vmatpush.msra.mxu0 %v2966_v54  ;;  %v5064_v38 = vld [vmem:[#allocation56_spill] sm:$0xff]  ;;  %v5075_v54 = vld [vmem:[#allocation37_spill] sm:$0xff] }
 0x2a4   :  { %1445 = vmatpush.msra.mxu2 %v2721_v5  ;;  %1465 = vmatpush.msrb.mxu3 %v2801_v21  ;;  %v5048_v5 = vld [vmem:[#allocation24_spill] sm:$0xff]  ;;  %v5052_v21 = vld [vmem:[#allocation23_spill] sm:$0xff]  ;;  %v5076_v55 = vld [vmem:[#allocation53_spill] sm:$0xff] }
 0x2a5   :  { %1485 = vmatpush.msrb.mxu1 %v2881_v37  ;;  %1505 = vmatpush.msra.mxu0 %v2961_v53  ;;  %v5063_v37 = vld [vmem:[#allocation40_spill] sm:$0xff]  ;;  %v5074_v53 = vld [vmem:[#allocation87_spill] sm:$0xff] }
 0x2a6   :  { %1446 = vmatpush.msra.mxu2 %v5041_v7  ;;  %1466 = vmatpush.msrb.mxu3 %v5042_v8  ;;  %v5089_v7 = vld [vmem:[#allocation67_spill] sm:$0xff] }
 0x2a7   :  { %1486 = vmatpush.msrb.mxu1 %v5043_v9  ;;  %1506 = vmatpush.msra.mxu0 %v5044_v6  ;;  %v5090_v8 = vld [vmem:[#allocation83_spill] sm:$0xff]  ;;  %v5091_v9 = vld [vmem:[#allocation33_spill] sm:$0xff] }
 0x2a8   :  { %1447 = vmatpush.msra.mxu2 %v5045_v10  ;;  %1467 = vmatpush.msrb.mxu3 %v5046_v11  ;;  %v5092_v6 = vld [vmem:[#allocation49_spill] sm:$0xff]  ;;  %v5093_v10 = vld [vmem:[#allocation66_spill] sm:$0xff] }
 0x2a9   :  { %1487 = vmatpush.msrb.mxu1 %v5047_v12  ;;  %1507 = vmatpush.msra.mxu0 %v5048_v5  ;;  %v5094_v11 = vld [vmem:[#allocation82_spill] sm:$0xff]  ;;  %v5095_v12 = vld [vmem:[#allocation32_spill] sm:$0xff] }
 0x2aa   :  { %1448 = vmatpush.msra.mxu2 %v5049_v13  ;;  %1468 = vmatpush.msrb.mxu3 %v5050_v14  ;;  %v5096_v5 = vld [vmem:[#allocation48_spill] sm:$0xff]  ;;  %v5097_v13 = vld [vmem:[#allocation65_spill] sm:$0xff] }
 0x2ab   :  { %1488 = vmatpush.msrb.mxu1 %v5051_v15  ;;  %1508 = vmatpush.msra.mxu0 %v5052_v21  ;;  %v5098_v14 = vld [vmem:[#allocation81_spill] sm:$0xff]  ;;  %v5099_v15 = vld [vmem:[#allocation31_spill] sm:$0xff] }
 0x2ac   :  { %1449 = vmatpush.msra.mxu2 %v5053_v22  ;;  %1469 = vmatpush.msrb.mxu3 %v5054_v23  ;;  %v5100_v21 = vld [vmem:[#allocation47_spill] sm:$0xff]  ;;  %v5101_v22 = vld [vmem:[#allocation64_spill] sm:$0xff] }
 0x2ad   :  { %1489 = vmatpush.msrb.mxu1 %v5055_v24  ;;  %1509 = vmatpush.msra.mxu0 %v5056_v25  ;;  %v5102_v23 = vld [vmem:[#allocation80_spill] sm:$0xff]  ;;  %v5103_v24 = vld [vmem:[#allocation30_spill] sm:$0xff] }
 0x2ae   :  { %1450 = vmatpush.msra.mxu2 %v5057_v26  ;;  %1470 = vmatpush.msrb.mxu3 %v5058_v27  ;;  %v5104_v25 = vld [vmem:[#allocation46_spill] sm:$0xff]  ;;  %v5105_v26 = vld [vmem:[#allocation63_spill] sm:$0xff] }
 0x2af   :  { %1490 = vmatpush.msrb.mxu1 %v5061_v30  ;;  %1510 = vmatpush.msra.mxu0 %v5062_v31  ;;  %v5106_v27 = vld [vmem:[#allocation218_spill] sm:$0xff]  ;;  %v5109_v30 = vld [vmem:[#allocation45_spill] sm:$0xff] }
 0x2b0   :  { %1515 = vmatpush.msrb.mxu2 %v5059_v28  ;;  %1535 = vmatpush.msra.mxu3 %v5060_v29  ;;  %v5107_v28 = vmax.f32 %v5106_v27, 0.0  ;;  %v5108_v29 = vld [vmem:[#allocation29_spill] sm:$0xff]  ;;  %v5110_v31 = vld [vmem:[#allocation62_spill] sm:$0xff]  ;;  %v5155_v27 = vld [vmem:[#allocation152_spill] sm:$0xff] }
 0x2b1   :  { %1555 = vmatpush.msra.mxu1 %v5065_v39  ;;  %1575 = vmatpush.msrb.mxu0 %v5066_v40  ;;  %v5113_v39 = vld [vmem:[#allocation44_spill] sm:$0xff]  ;;  %v5114_v40 = vld [vmem:[#allocation219_spill] sm:$0xff] }
 0x2b2   :  { %1516 = vmatpush.msrb.mxu2 %v5063_v37  ;;  %1536 = vmatpush.msra.mxu3 %v5064_v38  ;;  %v5111_v37 = vld [vmem:[#allocation79_spill] sm:$0xff]  ;;  %v5112_v38 = vld [vmem:[#allocation28_spill] sm:$0xff] }
 0x2b3   :  { %1556 = vmatpush.msra.mxu1 %v5069_v43  ;;  %1576 = vmatpush.msrb.mxu0 %v5070_v44  ;;  %v5117_v43 = vld [vmem:[#allocation27_spill] sm:$0xff] }
 0x2b4   :  { %1517 = vmatpush.msrb.mxu2 %v5067_v41  ;;  %1537 = vmatpush.msra.mxu3 %v5068_v42  ;;  %v5115_v41 = vmax.f32 %v5114_v40, 0.0  ;;  %v5116_v42 = vld [vmem:[#allocation61_spill] sm:$0xff]  ;;  %v5118_v44 = vld [vmem:[#allocation43_spill] sm:$0xff]  ;;  %v5163_v40 = vld [vmem:[#allocation96_spill] sm:$0xff] }
 0x2b5   :  { %1557 = vmatpush.msra.mxu1 %v5073_v47  ;;  %1577 = vmatpush.msrb.mxu0 %v5074_v53  ;;  %v5121_v47 = vld [vmem:[#allocation26_spill] sm:$0xff] }
 0x2b6   :  { %1518 = vmatpush.msrb.mxu2 %v5071_v45  ;;  %1538 = vmatpush.msra.mxu3 %v5072_v46  ;;  %v5119_v45 = vld [vmem:[#allocation78_spill] sm:$0xff]  ;;  %v5120_v46 = vld [vmem:[#allocation60_spill] sm:$0xff] }
 0x2b7   :  { %1558 = vmatpush.msra.mxu1 %v5077_v56  ;;  %1578 = vmatpush.msrb.mxu0 %v5078_v57  ;;  %v5122_v53 = vld [vmem:[#allocation42_spill] sm:$0xff]  ;;  %v5125_v56 = vld [vmem:[#allocation77_spill] sm:$0xff]  ;;  %v5126_v57 = vld [vmem:[#allocation59_spill] sm:$0xff] }
 0x2b8   :  { %1519 = vmatpush.msrb.mxu2 %v5075_v54  ;;  %1539 = vmatpush.msra.mxu3 %v5076_v55  ;;  %v5123_v54 = vld [vmem:[#allocation105_spill] sm:$0xff] }
 0x2b9   :  { %1559 = vmatpush.msra.mxu1 %v5081_v60  ;;  %1579 = vmatpush.msrb.mxu0 %v5082_v61  ;;  %v5124_v55 = vld [vmem:[#allocation121_spill] sm:$0xff]  ;;  %v5129_v60 = vld [vmem:[#allocation76_spill] sm:$0xff]  ;;  %v5130_v61 = vmax.f32 %v4194_v1, 0.0 }
 0x2ba   :  { %1520 = vmatpush.msrb.mxu2 %v5079_v58  ;;  %1540 = vmatpush.msra.mxu3 %v5080_v59  ;;  %v5127_v58 = vld [vmem:[#allocation104_spill] sm:$0xff]  ;;  %v5141_v1 = vld [vmem:[#allocation101_spill] sm:$0xff] }
 0x2bb   :  { %1560 = vmatpush.msra.mxu1 %v5085_v0  ;;  %1580 = vmatpush.msrb.mxu0 %v5086_v17  ;;  %v5128_v59 = vld [vmem:[#allocation120_spill] sm:$0xff]  ;;  %v5133_v0 = vld [vmem:[#allocation58_spill] sm:$0xff]  ;;  %v5134_v17 = vld [vmem:[#allocation75_spill] sm:$0xff] }
 0x2bc   :  { %1521 = vmatpush.msrb.mxu2 %v5083_v62  ;;  %1541 = vmatpush.msra.mxu3 %v5084_v63  ;;  %v5131_v62 = vld [vmem:[#allocation103_spill] sm:$0xff] }
 0x2bd   :  { %1561 = vmatpush.msra.mxu1 %v5089_v7  ;;  %1581 = vmatpush.msrb.mxu0 %v5090_v8  ;;  %v5132_v63 = vld [vmem:[#allocation119_spill] sm:$0xff]  ;;  %v5137_v7 = vld [vmem:[#allocation236_spill] sm:$0xff] }
 0x2be   :  { %1522 = vmatpush.msrb.mxu2 %v5087_v48  ;;  %1542 = vmatpush.msra.mxu3 %v5088_v35  ;;  %v5135_v48 = vld [vmem:[#allocation102_spill] sm:$0xff]  ;;  %v5138_v8 = vmax.f32 %v5137_v7, 0.0  ;;  %v5186_v7 = vld [vmem:[#allocation128_spill] sm:$0xff] }
 0x2bf   :  { %1562 = vmatpush.msra.mxu1 %v5093_v10  ;;  %1582 = vmatpush.msrb.mxu0 %v5094_v11  ;;  %v5136_v35 = vld [vmem:[#allocation118_spill] sm:$0xff]  ;;  %v5142_v10 = vld [vmem:[#allocation117_spill] sm:$0xff] }
 0x2c0   :  { %1523 = vmatpush.msrb.mxu2 %v5091_v9  ;;  %1543 = vmatpush.msra.mxu3 %v5092_v6  ;;  %v5139_v9 = vld [vmem:[#allocation239_spill] sm:$0xff]  ;;  %v5143_v11 = vld [vmem:[#allocation137_spill] sm:$0xff] }
 0x2c1   :  { %1563 = vmatpush.msra.mxu1 %v5097_v13  ;;  %1583 = vmatpush.msrb.mxu0 %v5098_v14  ;;  %v5140_v6 = vmax.f32 %v5139_v9, 0.0  ;;  %v5146_v13 = vld [vmem:[#allocation238_spill] sm:$0xff] }
 0x2c2   :  { %1524 = vmatpush.msrb.mxu2 %v5095_v12  ;;  %1544 = vmatpush.msra.mxu3 %v5096_v5  ;;  %v5144_v12 = vld [vmem:[#allocation74_spill] sm:$0xff]  ;;  %v5145_v5 = vld [vmem:[#allocation100_spill] sm:$0xff]  ;;  %v5147_v14 = vmax.f32 %v5146_v13, 0.0  ;;  %v5195_v13 = vld [vmem:[#allocation143_spill] sm:$0xff] }
 0x2c3   :  { %1564 = vmatpush.msra.mxu1 %v5101_v22  ;;  %1584 = vmatpush.msrb.mxu0 %v5102_v23  ;;  %v5150_v22 = vld [vmem:[#allocation99_spill] sm:$0xff]  ;;  %v5151_v23 = vld [vmem:[#allocation153_spill] sm:$0xff]  ;;  %v5188_v9 = vld [vmem:[#allocation90_spill] sm:$0xff] }
 0x2c4   :  { %1525 = vmatpush.msrb.mxu2 %v5099_v15  ;;  %1545 = vmatpush.msra.mxu3 %v5100_v21  ;;  %v5148_v15 = vld [vmem:[#allocation116_spill] sm:$0xff] }
 0x2c5   :  { %1565 = vmatpush.msra.mxu1 %v5105_v26  ;;  %1451 = vmatmul.f32.vlgmr.msra.gmra.mxu2 %v5107_v28  ;;  %v5149_v21 = vld [vmem:[#allocation136_spill] sm:$0xff]  ;;  %v5154_v26 = vld [vmem:[#allocation98_spill] sm:$0xff] }
 0x2c6   :  { %1526 = vmatpush.msrb.mxu2 %v5103_v24  ;;  %1546 = vmatpush.msra.mxu3 %v5104_v25  ;;  %v5152_v24 = vld [vmem:[#allocation115_spill] sm:$0xff]  ;;  %v5156_v28 = vld [vmem:[#allocation114_spill] sm:$0xff] }
 0x2c7   :  { %1566 = vmatpush.msra.mxu1 %v5110_v31  ;;  %1585 = vmatpush.msrb.mxu0 %v5111_v37  ;;  %v5153_v25 = vld [vmem:[#allocation135_spill] sm:$0xff]  ;;  %v5160_v37 = vld [vmem:[#allocation241_spill] sm:$0xff] }
 0x2c8   :  { %1527 = vmatpush.msrb.mxu2 %v5108_v29  ;;  %1547 = vmatpush.msra.mxu3 %v5109_v30  ;;  %v5157_v29 = vld [vmem:[#allocation134_spill] sm:$0xff]  ;;  %v5158_v30 = vld [vmem:[#allocation97_spill] sm:$0xff]  ;;  %v5159_v31 = vld [vmem:[#allocation151_spill] sm:$0xff] }
 0x2c9   :  { %1471 = vmatmul.f32.vlgmr.msrb.gmra.mxu3 %v5115_v41  ;;  %1567 = vmatpush.msra.mxu1 %v5116_v42  ;;  %v5164_v41 = vld [vmem:[#allocation133_spill] sm:$0xff]  ;;  %v5165_v42 = vld [vmem:[#allocation150_spill] sm:$0xff] }
 0x2ca   :  { %1528 = vmatpush.msrb.mxu2 %v5112_v38  ;;  %1548 = vmatpush.msra.mxu3 %v5113_v39  ;;  %v5161_v38 = vmax.f32 %v5160_v37, 0.0  ;;  %v5162_v39 = vld [vmem:[#allocation113_spill] sm:$0xff]  ;;  %v5211_v37 = vld [vmem:[#allocation182_spill] sm:$0xff] }
 0x2cb   :  { %1586 = vmatpush.msrb.mxu0 %v5119_v45  ;;  %1568 = vmatpush.msra.mxu1 %v5120_v46  ;;  %v5169_v46 = vld [vmem:[#allocation95_spill] sm:$0xff] }
 0x2cc   :  { %1529 = vmatpush.msrb.mxu2 %v5117_v43  ;;  %1549 = vmatpush.msra.mxu3 %v5118_v44  ;;  %v5166_v43 = vld [vmem:[#allocation112_spill] sm:$0xff]  ;;  %v5167_v44 = vld [vmem:[#allocation237_spill] sm:$0xff] }
 0x2cd   :  { %1587 = vmatpush.msrb.mxu0 %v5125_v56  ;;  %1569 = vmatpush.msra.mxu1 %v5126_v57  ;;  %v5168_v45 = vmax.f32 %v5167_v44, 0.0  ;;  %v5174_v56 = vld [vmem:[#allocation131_spill] sm:$0xff]  ;;  %v5175_v57 = vld [vmem:[#allocation148_spill] sm:$0xff] }
 0x2ce   :  { %1530 = vmatpush.msrb.mxu2 %v5121_v47  ;;  %1550 = vmatpush.msra.mxu3 %v5122_v53  ;;  %v5170_v47 = vld [vmem:[#allocation132_spill] sm:$0xff]  ;;  %v5171_v53 = vld [vmem:[#allocation149_spill] sm:$0xff]  ;;  %v5218_v44 = vld [vmem:[#allocation163_spill] sm:$0xff] }
 0x2cf   :  { %1588 = vmatpush.msrb.mxu0 %v5129_v60  ;;  %1531 = vmatmul.f32.vlgmr.msrb.gmra.mxu2 %v5130_v61  ;;  %v5178_v60 = vld [vmem:[#allocation130_spill] sm:$0xff]  ;;  %v5179_v61 = vld [vmem:[#allocation147_spill] sm:$0xff] }
 0x2d0   :  { %1595 = vmatpush.msra.mxu2 %v5123_v54  ;;  %1615 = vmatpush.msrb.mxu3 %v5124_v55  ;;  %v5172_v54 = vld [vmem:[#allocation94_spill] sm:$0xff]  ;;  %v5173_v55 = vld [vmem:[#allocation111_spill] sm:$0xff] }
 0x2d1   :  { %1570 = vmatpush.msra.mxu1 %v5133_v0  ;;  %1589 = vmatpush.msrb.mxu0 %v5134_v17  ;;  %v5182_v0 = vld [vmem:[#allocation129_spill] sm:$0xff]  ;;  %v5183_v17 = vld [vmem:[#allocation146_spill] sm:$0xff] }
 0x2d2   :  { %1596 = vmatpush.msra.mxu2 %v5127_v58  ;;  %1616 = vmatpush.msrb.mxu3 %v5128_v59  ;;  %v5176_v58 = vld [vmem:[#allocation93_spill] sm:$0xff]  ;;  %v5177_v59 = vld [vmem:[#allocation110_spill] sm:$0xff] }
 0x2d3   :  { %1491 = vmatmul.f32.vlgmr.msrb.gmra.mxu1 %v5138_v8  ;;  %1551 = vmatmul.f32.vlgmr.msra.gmra.mxu3 %v5140_v6  ;;  %v5187_v8 = vld [vmem:[#allocation145_spill] sm:$0xff]  ;;  %v5189_v6 = vld [vmem:[#allocation107_spill] sm:$0xff] }
 0x2d4   :  { %1597 = vmatpush.msra.mxu2 %v5131_v62  ;;  %1617 = vmatpush.msrb.mxu3 %v5132_v63  ;;  %v5180_v62 = vld [vmem:[#allocation92_spill] sm:$0xff]  ;;  %v5181_v63 = vld [vmem:[#allocation109_spill] sm:$0xff] }
 0x2d5   :  { %1635 = vmatpush.msrb.mxu1 %v5143_v11  ;;  %1590 = vmatpush.msrb.mxu0 %v5144_v12  ;;  %v5192_v11 = vld [vmem:[#allocation106_spill] sm:$0xff]  ;;  %v5193_v12 = vld [vmem:[#allocation169_spill] sm:$0xff] }
 0x2d6   :  { %1598 = vmatpush.msra.mxu2 %v5135_v48  ;;  %1618 = vmatpush.msrb.mxu3 %v5136_v35  ;;  %v5184_v48 = vld [vmem:[#allocation91_spill] sm:$0xff]  ;;  %v5185_v35 = vld [vmem:[#allocation108_spill] sm:$0xff] }
 0x2d7   :  { %1511 = vmatmul.f32.vlgmr.msra.gmra.mxu0 %v5147_v14  ;;  %1636 = vmatpush.msrb.mxu1 %v5149_v21  ;;  %v5196_v14 = vld [vmem:[#allocation243_spill] sm:$0xff]  ;;  %v5198_v21 = vld [vmem:[#allocation168_spill] sm:$0xff] }
 0x2d8   :  { %1599 = vmatpush.msra.mxu2 %v5141_v1  ;;  %1619 = vmatpush.msrb.mxu3 %v5142_v10  ;;  %v5190_v1 = vld [vmem:[#allocation127_spill] sm:$0xff]  ;;  %v5191_v10 = vld [vmem:[#allocation144_spill] sm:$0xff] }
 0x2d9   :  { %1655 = vmatpush.msra.mxu0 %v5151_v23  ;;  %1637 = vmatpush.msrb.mxu1 %v5153_v25  ;;  %v5200_v23 = vld [vmem:[#allocation125_spill] sm:$0xff]  ;;  %v5204_v25 = vld [vmem:[#allocation124_spill] sm:$0xff] }
 0x2da   :  { %1600 = vmatpush.msra.mxu2 %v5145_v5  ;;  %1620 = vmatpush.msrb.mxu3 %v5148_v15  ;;  %v5194_v5 = vld [vmem:[#allocation126_spill] sm:$0xff]  ;;  %v5197_v15 = vmax.f32 %v5196_v14, 0.0  ;;  %v5249_v14 = vld [vmem:[#allocation173_spill] sm:$0xff] }
 0x2db   :  { %1656 = vmatpush.msra.mxu0 %v5155_v27  ;;  %1638 = vmatpush.msrb.mxu1 %v5157_v29  ;;  %v5206_v27 = vld [vmem:[#allocation166_spill] sm:$0xff]  ;;  %v5208_v29 = vld [vmem:[#allocation123_spill] sm:$0xff] }
 0x2dc   :  { %1601 = vmatpush.msra.mxu2 %v5150_v22  ;;  %1621 = vmatpush.msrb.mxu3 %v5152_v24  ;;  %v5199_v22 = vld [vmem:[#allocation185_spill] sm:$0xff]  ;;  %v5201_v24 = vld [vmem:[#allocation142_spill] sm:$0xff] }
 0x2dd   :  { %1657 = vmatpush.msra.mxu0 %v5159_v31  ;;  %1571 = vmatmul.f32.vlgmr.msra.gmra.mxu1 %v5161_v38  ;;  %v5210_v31 = vld [vmem:[#allocation165_spill] sm:$0xff]  ;;  %v5212_v38 = vld [vmem:[#allocation122_spill] sm:$0xff] }
 0x2de   :  { %1602 = vmatpush.msra.mxu2 %v5154_v26  ;;  %1622 = vmatpush.msrb.mxu3 %v5156_v28  ;;  %v5205_v26 = vld [vmem:[#allocation141_spill] sm:$0xff]  ;;  %v5207_v28 = vld [vmem:[#allocation183_spill] sm:$0xff] }
 0x2df   :  { %1639 = vmatpush.msrb.mxu1 %v5164_v41  ;;  %1658 = vmatpush.msra.mxu0 %v5165_v42  ;;  %v5215_v41 = vld [vmem:[#allocation181_spill] sm:$0xff] }
 0x2e0   :  { %1603 = vmatpush.msra.mxu2 %v5158_v30  ;;  %1623 = vmatpush.msrb.mxu3 %v5162_v39  ;;  %v5209_v30 = vld [vmem:[#allocation140_spill] sm:$0xff]  ;;  %v5213_v39 = vld [vmem:[#allocation139_spill] sm:$0xff]  ;;  %v5216_v42 = vld [vmem:[#allocation201_spill] sm:$0xff] }
 0x2e1   :  { %1591 = vmatmul.f32.vlgmr.msrb.gmra.mxu0 %v5168_v45  ;;  %1640 = vmatpush.msrb.mxu1 %v5170_v47  ;;  %v5219_v45 = vld [vmem:[#allocation242_spill] sm:$0xff]  ;;  %v5221_v47 = vld [vmem:[#allocation180_spill] sm:$0xff] }
 0x2e2   :  { %1604 = vmatpush.msra.mxu2 %v5163_v40  ;;  %1624 = vmatpush.msrb.mxu3 %v5166_v43  ;;  %v5214_v40 = vld [vmem:[#allocation164_spill] sm:$0xff]  ;;  %v5217_v43 = vld [vmem:[#allocation138_spill] sm:$0xff] }
 0x2e3   :  { %1659 = vmatpush.msra.mxu0 %v5171_v53  ;;  %1641 = vmatpush.msrb.mxu1 %v5174_v56  ;;  %v5222_v53 = vld [vmem:[#allocation200_spill] sm:$0xff] }
 0x2e4   :  { %1605 = vmatpush.msra.mxu2 %v5169_v46  ;;  %1625 = vmatpush.msrb.mxu3 %v5173_v55  ;;  %v5220_v46 = vmax.f32 %v5219_v45, 0.0  ;;  %v5226_v55 = vld [vmem:[#allocation199_spill] sm:$0xff]  ;;  %v5227_v56 = vld [vmem:[#allocation216_spill] sm:$0xff]  ;;  %v5276_v45 = vld [vmem:[#allocation186_spill] sm:$0xff] }
 0x2e5   :  { %1660 = vmatpush.msra.mxu0 %v5175_v57  ;;  %1642 = vmatpush.msrb.mxu1 %v5178_v60  ;;  %v5228_v57 = vld [vmem:[#allocation161_spill] sm:$0xff]  ;;  %v5231_v60 = vld [vmem:[#allocation215_spill] sm:$0xff] }
 0x2e6   :  { %1606 = vmatpush.msra.mxu2 %v5172_v54  ;;  %1626 = vmatpush.msrb.mxu3 %v5177_v59  ;;  %v5223_v54 = vld [vmem:[#allocation217_spill] sm:$0xff]  ;;  %v5230_v59 = vld [vmem:[#allocation198_spill] sm:$0xff] }
 0x2e7   :  { %1661 = vmatpush.msra.mxu0 %v5179_v61  ;;  %1643 = vmatpush.msrb.mxu1 %v5182_v0  ;;  %v5232_v61 = vld [vmem:[#allocation160_spill] sm:$0xff]  ;;  %v5235_v0 = vld [vmem:[#allocation214_spill] sm:$0xff] }
 0x2e8   :  { %1607 = vmatpush.msra.mxu2 %v5176_v58  ;;  %1627 = vmatpush.msrb.mxu3 %v5181_v63  ;;  %v5229_v58 = vld [vmem:[#allocation178_spill] sm:$0xff]  ;;  %v5234_v63 = vld [vmem:[#allocation197_spill] sm:$0xff] }
 0x2e9   :  { %1662 = vmatpush.msra.mxu0 %v5183_v17  ;;  %1644 = vmatpush.msrb.mxu1 %v5186_v7  ;;  %v5236_v17 = vld [vmem:[#allocation159_spill] sm:$0xff]  ;;  %v5239_v7 = vld [vmem:[#allocation213_spill] sm:$0xff] }
 0x2ea   :  { %1608 = vmatpush.msra.mxu2 %v5180_v62  ;;  %1628 = vmatpush.msrb.mxu3 %v5185_v35  ;;  %v5233_v62 = vld [vmem:[#allocation177_spill] sm:$0xff]  ;;  %v5238_v35 = vld [vmem:[#allocation196_spill] sm:$0xff] }
 0x2eb   :  { %1663 = vmatpush.msra.mxu0 %v5187_v8  ;;  %1645 = vmatpush.msrb.mxu1 %v5190_v1  ;;  %v5240_v8 = vld [vmem:[#allocation158_spill] sm:$0xff]  ;;  %v5243_v1 = vld [vmem:[#allocation212_spill] sm:$0xff] }
 0x2ec   :  { %1609 = vmatpush.msra.mxu2 %v5184_v48  ;;  %1629 = vmatpush.msrb.mxu3 %v5189_v6  ;;  %v5237_v48 = vld [vmem:[#allocation176_spill] sm:$0xff]  ;;  %v5242_v6 = vld [vmem:[#allocation195_spill] sm:$0xff] }
 0x2ed   :  { %1664 = vmatpush.msra.mxu0 %v5191_v10  ;;  %1646 = vmatpush.msrb.mxu1 %v5194_v5  ;;  %v5244_v10 = vld [vmem:[#allocation157_spill] sm:$0xff]  ;;  %v5247_v5 = vld [vmem:[#allocation211_spill] sm:$0xff] }
 0x2ee   :  { %1610 = vmatpush.msra.mxu2 %v5188_v9  ;;  %1630 = vmatpush.msrb.mxu3 %v5192_v11  ;;  %v5241_v9 = vld [vmem:[#allocation175_spill] sm:$0xff]  ;;  %v5245_v11 = vld [vmem:[#allocation174_spill] sm:$0xff] }
 0x2ef   :  { %1611 = vmatmul.f32.vlgmr.msra.gmra.mxu2 %v1061_v2  ;;  %1665 = vmatpush.msra.mxu0 %v5195_v13  ;;  %v5202_v2 = vld [vmem:[#allocation167_spill] sm:$0xff]  ;;  %v5248_v13 = vld [vmem:[#allocation156_spill] sm:$0xff] }
 0x2f0   :  { %1675 = vmatpush.msrb.mxu2 %v5193_v12  ;;  %1631 = vmatmul.f32.vlgmr.msrb.gmra.mxu3 %v5197_v15  ;;  %v5246_v12 = vld [vmem:[#allocation194_spill] sm:$0xff]  ;;  %v5250_v15 = vld [vmem:[#allocation193_spill] sm:$0xff] }
 0x2f1   :  { %1695 = vmatpush.msra.mxu3 %v5199_v22  ;;  %1647 = vmatpush.msrb.mxu1 %v5200_v23  ;;  %v5252_v22 = vld [vmem:[#allocation155_spill] sm:$0xff]  ;;  %v5253_v23 = vld [vmem:[#allocation172_spill] sm:$0xff] }
 0x2f2   :  { %1676 = vmatpush.msrb.mxu2 %v5198_v21  ;;  %1666 = vmatpush.msra.mxu0 %v5201_v24  ;;  %v5251_v21 = vld [vmem:[#allocation210_spill] sm:$0xff]  ;;  %v5254_v24 = vld [vmem:[#allocation192_spill] sm:$0xff] }
 0x2f3   :  { %1696 = vmatpush.msra.mxu3 %v5203_v34  ;;  %1648 = vmatpush.msrb.mxu1 %v5204_v25  ;;  %v5256_v34 = vld [vmem:[#allocation154_spill] sm:$0xff]  ;;  %v5257_v25 = vld [vmem:[#allocation171_spill] sm:$0xff] }
 0x2f4   :  { %1677 = vmatpush.msrb.mxu2 %v5202_v2  ;;  %1667 = vmatpush.msra.mxu0 %v5205_v26  ;;  %v5255_v2 = vld [vmem:[#allocation209_spill] sm:$0xff]  ;;  %v5258_v26 = vld [vmem:[#allocation191_spill] sm:$0xff] }
 0x2f5   :  { %1697 = vmatpush.msra.mxu3 %v5207_v28  ;;  %1649 = vmatpush.msrb.mxu1 %v5208_v29  ;;  %v5260_v28 = vld [vmem:[#allocation170_spill] sm:$0xff] }
 0x2f6   :  { %1678 = vmatpush.msrb.mxu2 %v5206_v27  ;;  %1668 = vmatpush.msra.mxu0 %v5209_v30  ;;  %v5259_v27 = vld [vmem:[#allocation208_spill] sm:$0xff]  ;;  %v5261_v29 = vld [vmem:[#allocation190_spill] sm:$0xff]  ;;  %v5262_v30 = vld [vmem:[#allocation207_spill] sm:$0xff] }
 0x2f7   :  { %1698 = vmatpush.msra.mxu3 %v5211_v37  ;;  %1650 = vmatpush.msrb.mxu1 %v5212_v38  ;;  %v5264_v37 = vld [vmem:[#allocation189_spill] sm:$0xff]  ;;  %v5265_v38 = vld [vmem:[#allocation206_spill] sm:$0xff] }
 0x2f8   :  { %1679 = vmatpush.msrb.mxu2 %v5210_v31  ;;  %1669 = vmatpush.msra.mxu0 %v5213_v39  ;;  %v5263_v31 = vld [vmem:[#allocation220_spill] sm:$0xff]  ;;  %v5266_v39 = vld [vmem:[#allocation234_spill] sm:$0xff] }
 0x2f9   :  { %1651 = vmatmul.f32.vlgmr.msrb.gmra.mxu1 %v1063_v50  ;;  %1699 = vmatpush.msra.mxu3 %v5215_v41  ;;  %v5225_v50 = vld [vmem:[#allocation179_spill] sm:$0xff] }
 0x2fa   :  { %1680 = vmatpush.msrb.mxu2 %v5214_v40  ;;  %1715 = vmatpush.msra.mxu1 %v5216_v42  ;;  %v5267_v40 = vld [vmem:[#allocation228_spill] sm:$0xff]  ;;  %v5270_v41 = vld [vmem:[#allocation235_spill] sm:$0xff] }
 0x2fb   :  { %1670 = vmatpush.msra.mxu0 %v5217_v43  ;;  %1700 = vmatpush.msra.mxu3 %v5221_v47  ;;  %v5271_v42 = vld [vmem:[#allocation227_spill] sm:$0xff]  ;;  %v5274_v43 = vld [vmem:[#allocation240_spill] sm:$0xff]  ;;  %v5278_v47 = vld [vmem:[#allocation225_spill] sm:$0xff] }
 0x2fc   :  { %1681 = vmatpush.msrb.mxu2 %v5218_v44  ;;  %1671 = vmatmul.f32.vlgmr.msra.gmra.mxu0 %v5220_v46  ;;  %v5275_v44 = vld [vmem:[#allocation226_spill] sm:$0xff]  ;;  %v5277_v46 = vld [vmem:[#allocation203_spill] sm:$0xff] }
 0x2fd   :  { %1716 = vmatpush.msra.mxu1 %v5222_v53  ;;  %1735 = vmatpush.msrb.mxu0 %v5223_v54  ;;  %v5279_v53 = vld [vmem:[#allocation202_spill] sm:$0xff]  ;;  %v5280_v54 = vmov 0.0  }
 0x2fe   :  { %1682 = vmatpush.msrb.mxu2 %v5224_v52  ;;  %1701 = vmatpush.msra.mxu3 %v5225_v50  ;;  %v5281_v52 = vld [vmem:[#allocation224_spill] sm:$0xff] }
 0x2ff   :  { %1717 = vmatpush.msra.mxu1 %v5226_v55  ;;  %1736 = vmatpush.msrb.mxu0 %v5227_v56  ;;  %v5282_v50 = vld [vmem:[#allocation232_spill] sm:$0xff]  ;;  %v5287_v55 = vld [vmem:[#allocation221_spill] sm:$0xff] }
 0x300   :  { %1683 = vmatpush.msrb.mxu2 %v5228_v57  ;;  %1702 = vmatpush.msra.mxu3 %v5229_v58  ;;  %v5288_v56 = vld [vmem:[#allocation229_spill] sm:$0xff] }
 0x301   :  { %1718 = vmatpush.msra.mxu1 %v5230_v59  ;;  %1737 = vmatpush.msrb.mxu0 %v5231_v60  ;;  %v2606_v57 = vld [vmem:[%s4765_s5] ss:$0 sm:$0xff] }
 0x302   :  { %1684 = vmatpush.msrb.mxu2 %v5232_v61  ;;  %1703 = vmatpush.msra.mxu3 %v5233_v62 }
 0x303   :  { %1719 = vmatpush.msra.mxu1 %v5234_v63  ;;  %1738 = vmatpush.msrb.mxu0 %v5235_v0 }
 0x304   :  { %1685 = vmatpush.msrb.mxu2 %v5236_v17  ;;  %1704 = vmatpush.msra.mxu3 %v5237_v48 }
 0x305   :  { %1720 = vmatpush.msra.mxu1 %v5238_v35  ;;  %1739 = vmatpush.msrb.mxu0 %v5239_v7 }
 0x306   :  { %1686 = vmatpush.msrb.mxu2 %v5240_v8  ;;  %1705 = vmatpush.msra.mxu3 %v5241_v9 }
 0x307   :  { %1721 = vmatpush.msra.mxu1 %v5242_v6  ;;  %1740 = vmatpush.msrb.mxu0 %v5243_v1 }
 0x308   :  { %1687 = vmatpush.msrb.mxu2 %v5244_v10  ;;  %1706 = vmatpush.msra.mxu3 %v5245_v11 }
 0x309   :  { %1722 = vmatpush.msra.mxu1 %v5246_v12  ;;  %1741 = vmatpush.msrb.mxu0 %v5247_v5 }
 0x30a   :  { %1688 = vmatpush.msrb.mxu2 %v5248_v13  ;;  %1707 = vmatpush.msra.mxu3 %v5249_v14 }
 0x30b   :  { %1723 = vmatpush.msra.mxu1 %v5250_v15  ;;  %1742 = vmatpush.msrb.mxu0 %v5251_v21 }
 0x30c   :  { %1689 = vmatpush.msrb.mxu2 %v5252_v22  ;;  %1708 = vmatpush.msra.mxu3 %v5253_v23 }
 0x30d   :  { %1724 = vmatpush.msra.mxu1 %v5254_v24  ;;  %1743 = vmatpush.msrb.mxu0 %v5255_v2 }
 0x30e   :  { %1690 = vmatpush.msrb.mxu2 %v5256_v34  ;;  %1709 = vmatpush.msra.mxu3 %v5257_v25 }
 0x30f   :  { %1725 = vmatpush.msra.mxu1 %v5258_v26  ;;  %1744 = vmatpush.msrb.mxu0 %v5259_v27 }
 0x310   :  { %1691 = vmatmul.f32.vlgmr.msrb.gmra.mxu2 %v1065_v3  ;;  %1710 = vmatpush.msra.mxu3 %v5260_v28  ;;  %v5269_v3 = vld [vmem:[#allocation205_spill] sm:$0xff] }
 0x311   :  { %1726 = vmatpush.msra.mxu1 %v5261_v29  ;;  %1745 = vmatpush.msrb.mxu0 %v5262_v30 }
 0x312   :  { %1711 = vmatmul.f32.vlgmr.msra.gmra.mxu3 %v1066_v4  ;;  %1770 = vmatpush.msra.mxu2 %v5263_v31  ;;  %v5273_v4 = vld [vmem:[#allocation204_spill] sm:$0xff] }
 0x313   :  { %1727 = vmatpush.msra.mxu1 %v5264_v37  ;;  %1746 = vmatpush.msrb.mxu0 %v5265_v38 }
 0x314   :  { %1771 = vmatpush.msra.mxu2 %v5266_v39  ;;  %1793 = vmatpush.msrb.mxu3 %v5267_v40  ;;  %v5289_v39 = vld [vmem:[#allocation233_spill] sm:$0xff] }
 0x315   :  { %1728 = vmatpush.msra.mxu1 %v5268_v49  ;;  %1747 = vmatpush.msrb.mxu0 %v5269_v3  ;;  %v4583_v49 = vperm.slane %v5289_v39, 0 }
 0x316   :  { %1772 = vmatpush.msra.mxu2 %v5270_v41  ;;  %1794 = vmatpush.msrb.mxu3 %v5271_v42 }
 0x317   :  { %1729 = vmatpush.msra.mxu1 %v5272_v32  ;;  %1748 = vmatpush.msrb.mxu0 %v5273_v4 }
 0x318   :  { %1773 = vmatpush.msra.mxu2 %v5274_v43  ;;  %1795 = vmatpush.msrb.mxu3 %v5275_v44 }
 0x319   :  { %1730 = vmatpush.msra.mxu1 %v5276_v45  ;;  %1749 = vmatpush.msrb.mxu0 %v5277_v46 }
 0x31a   :  { %1731 = vmatmul.f32.vlgmr.msra.gmra.mxu1 %v1067_v16  ;;  %1796 = vmatpush.msrb.mxu3 %v5278_v47  ;;  %v5284_v16 = vld [vmem:[#allocation231_spill] sm:$0xff] }
 0x31b   :  { %1750 = vmatpush.msrb.mxu0 %v5279_v53  ;;  %1797 = vmatmul.f32.vlgmr.msrb.gmra.mxu3 %v5280_v54 }
 0x31c   :  { %1751 = vmatmul.f32.vlgmr.msrb.gmra.mxu0 %v1068_v19  ;;  %1863 = vmatpush.msra.mxu3 %v5267_v40  ;;  %v5286_v19 = vld [vmem:[#allocation230_spill] sm:$0xff] }
 0x31d   :  { %1838 = vmatpush.msrb.mxu2 %v5281_v52  ;;  %1815 = vmatpush.msrb.mxu1 %v5282_v50 }
 0x31e   :  { %1864 = vmatpush.msra.mxu3 %v5271_v42  ;;  %1888 = vmatpush.msra.mxu0 %v5282_v50 }
 0x31f   :  { %1839 = vmatpush.msrb.mxu2 %v5283_v36  ;;  %1816 = vmatpush.msrb.mxu1 %v5284_v16 }
 0x320   :  { %1865 = vmatpush.msra.mxu3 %v5275_v44  ;;  %1889 = vmatpush.msra.mxu0 %v5284_v16 }
 0x321   :  { %1840 = vmatpush.msrb.mxu2 %v5285_v33  ;;  %1817 = vmatpush.msrb.mxu1 %v5286_v19 }
 0x322   :  { %1866 = vmatpush.msra.mxu3 %v5278_v47  ;;  %1890 = vmatpush.msra.mxu0 %v5286_v19 }
 0x323   :  { %1841 = vmatpush.msrb.mxu2 %v5287_v55  ;;  %1818 = vmatpush.msrb.mxu1 %v5288_v56 }
 0x324   :  { %1819 = vmatmul.f32.vlgmr.msrb.gmra.mxu1 %v5280_v54  ;;  %1891 = vmatpush.msra.mxu0 %v5288_v56 }
 0x325   :  { %1911 = vmatpush.msra.mxu1 %v5281_v52  ;;  %1961 = vmatpush.msrb.mxu3 %v5282_v50 }
 0x326   :  { %1985 = vmatpush.msrb.mxu0 %v5281_v52 }
 0x327   :  { %1912 = vmatpush.msra.mxu1 %v5283_v36  ;;  %1962 = vmatpush.msrb.mxu3 %v5284_v16 }
 0x328   :  { %1986 = vmatpush.msrb.mxu0 %v5283_v36 }
 0x329   :  { %1913 = vmatpush.msra.mxu1 %v5285_v33  ;;  %1963 = vmatpush.msrb.mxu3 %v5286_v19 }
 0x32a   :  { %1987 = vmatpush.msrb.mxu0 %v5285_v33 }
 0x32b   :  { %1914 = vmatpush.msra.mxu1 %v5287_v55  ;;  %1964 = vmatpush.msrb.mxu3 %v5288_v56 }
 0x32c   :  { %1988 = vmatpush.msrb.mxu0 %v5287_v55 }
 0x32d   :  { %2007 = vmatpush.msrb.mxu1 %v5267_v40 }
 0x32f   :  { %2008 = vmatpush.msrb.mxu1 %v5271_v42 }
 0x331   :  { %2009 = vmatpush.msrb.mxu1 %v5275_v44 }
 0x333   :  { %2010 = vmatpush.msrb.mxu1 %v5278_v47 }
 0x348   :  { %v1452_v58 = vpop.f32.mrf.mxu2 }
 0x349   :  { %v1453_v59 = vadd.f32 %v2606_v57, %v1452_v58 }
 0x34c   :  { %v1472_v60 = vpop.f32.mrf.mxu3 }
 0x34d   :  { %v1473_v61 = vadd.f32 %v1472_v60, %v1453_v59 }
 0x350   :  { %v1492_v62 = vpop.f32.mrf.mxu1 }
 0x351   :  { %v1493_v63 = vadd.f32 %v1492_v62, %v1473_v61 }
 0x352   :  { %v1532_v48 = vpop.f32.mrf.mxu2 }
 0x354   :  { %v1512_v0 = vpop.f32.mrf.mxu0 }
 0x355   :  { %v1513_v17 = vadd.f32 %v1512_v0, %v1493_v63 }
 0x356   :  { %v1552_v7 = vpop.f32.mrf.mxu3 }
 0x357   :  { %v1533_v35 = vadd.f32 %v1532_v48, %v1513_v17 }
 0x359   :  { %v1553_v8 = vadd.f32 %v1552_v7, %v1533_v35 }
 0x35a   :  { %v1572_v9 = vpop.f32.mrf.mxu1 }
 0x35b   :  { %v1573_v6 = vadd.f32 %v1572_v9, %v1553_v8 }
 0x35e   :  { %v1592_v1 = vpop.f32.mrf.mxu0 }
 0x35f   :  { %v1593_v11 = vadd.f32 %v1592_v1, %v1573_v6 }
 0x372   :  { %v1612_v10 = vpop.f32.mrf.mxu2 }
 0x373   :  { %v1613_v12 = vadd.f32 %v1612_v10, %v1593_v11  ;;  %v1632_v5 = vpop.f32.mrf.mxu3 }
 0x375   :  { %v1633_v13 = vadd.f32 %v1632_v5, %v1613_v12 }
 0x376   :  { %v1652_v14 = vpop.f32.mrf.mxu1 }
 0x377   :  { %v1653_v15 = vadd.f32 %v1652_v14, %v1633_v13 }
 0x379   :  { %v1672_v21 = vpop.f32.mrf.mxu0 }
 0x37a   :  { %v1673_v22 = vadd.f32 %v1672_v21, %v1653_v15 }
 0x393   :  { %v1692_v23 = vpop.f32.mrf.mxu2 }
 0x394   :  { %v1693_v24 = vadd.f32 %v1692_v23, %v1673_v22 }
 0x395   :  { %v1712_v2 = vpop.f32.mrf.mxu3 }
 0x396   :  { %v1713_v34 = vadd.f32 %v1712_v2, %v1693_v24 }
 0x397   :  { %v1732_v25 = vpop.f32.mrf.mxu1 }
 0x398   :  { %v1733_v26 = vadd.f32 %v1732_v25, %v1713_v34 }
 0x399   :  { %v1752_v27 = vpop.f32.mrf.mxu0 }
 0x39a   :  { %v1753_v28 = vadd.f32 %v1752_v27, %v1733_v26 }
 0x39c   :  { %2568 = vmatmul.msk.f32.vlgmr.msra.gmra.mxu2 %vm1142_vm7, %v1753_v28 }
 0x39d   :  { %1933 = vmatpush.msra.mxu2 %v5267_v40 }
 0x39e   :  { %v1798_v30 = vpop.f32.mrf.mxu3 }
 0x39f   :  { %1934 = vmatpush.msra.mxu2 %v5271_v42 }
 0x3a1   :  { %1935 = vmatpush.msra.mxu2 %v5275_v44 }
 0x3a3   :  { %1936 = vmatpush.msra.mxu2 %v5278_v47 }
 0x41f   :  { %v1775_v29 = vpop.f32.mrf.mxu2 }
 0x420   :  { %v1776_v31 = vadd.f32 %v4225_v18, %v1775_v29  ;;  %v1820_v18 = vpop.f32.mrf.mxu1 }
 0x422   :  { %v1801_v37 = vadd.f32 %v1798_v30, %v1776_v31 }
 0x424   :  { %v1802_v38 = vmax.f32 %v1801_v37, 0.0 }
 0x426   :  { %2569 = vmatmul.msk.f32.vlgmr.msrb.gmra.mxu2 %vm1142_vm7, %v1802_v38  ;;  %2570 = vmatmul.msk.f32.vlgmr.msra.gmra.mxu3 %vm1142_vm7, %v1802_v38 }
 0x427   :  { %2035 = vmatpush.msrb.mxu2 %v5282_v50  ;;  %2059 = vmatpush.msra.mxu3 %v5281_v52 }
 0x429   :  { %2036 = vmatpush.msrb.mxu2 %v5284_v16  ;;  %2060 = vmatpush.msra.mxu3 %v5283_v36 }
 0x42b   :  { %2037 = vmatpush.msrb.mxu2 %v5286_v19  ;;  %2061 = vmatpush.msra.mxu3 %v5285_v33 }
 0x42d   :  { %2038 = vmatpush.msrb.mxu2 %v5288_v56  ;;  %2062 = vmatpush.msra.mxu3 %v5287_v55 }
 0x4a9   :  { %v1843_v3 = vpop.f32.mrf.mxu2  ;;  %v1868_v41 = vpop.f32.mrf.mxu3 }
 0x4aa   :  { %v1844_v32 = vadd.f32 %v1843_v3, %v1820_v18  ;;  %v1871_v4 = vadd.f32 %v1868_v41, %v4228_v20 }
 0x4ac   :  { %v1849_v43 = vadd.f32 %v4583_v49, %v1844_v32  ;;  %v1872_v45 = vmax.f32 %v1871_v4, 0.0  ;;  %v2473_v4 = vld [vmem:[%s4773_s13 + $0x18] sm:$0xff] }
 0x4ae   :  { %v4587_v46 = vmax.f32 %v1849_v43, 0.0  ;;  %2572 = vmatmul.msk.f32.vlgmr.msra.gmra.mxu1 %vm1142_vm7, %v1872_v45  ;;  %2573 = vmatmul.msk.f32.vlgmr.msra.gmra.mxu2 %vm1142_vm7, %v1872_v45  ;;  %v2472_v43 = vld [vmem:[%s4773_s13 + $0x10] sm:$0xff]  ;;  %v2471_v45 = vld [vmem:[%s4773_s13 + $0x8] sm:$0xff] }
 0x4af   :  { %2133 = vmatpush.msra.mxu2 %v5281_v52  ;;  %2109 = vmatpush.msra.mxu1 %v5282_v50 }
 0x4b0   :  { %2571 = vmatmul.msk.f32.vlgmr.msra.gmra.mxu0 %vm1142_vm7, %v4587_v46 }
 0x4b1   :  { %2081 = vmatpush.msra.mxu0 %v5267_v40  ;;  %2134 = vmatpush.msra.mxu2 %v5283_v36 }
 0x4b2   :  { %2110 = vmatpush.msra.mxu1 %v5284_v16 }
 0x4b3   :  { %2082 = vmatpush.msra.mxu0 %v5271_v42  ;;  %2135 = vmatpush.msra.mxu2 %v5285_v33 }
 0x4b4   :  { %2111 = vmatpush.msra.mxu1 %v5286_v19 }
 0x4b5   :  { %2083 = vmatpush.msra.mxu0 %v5275_v44  ;;  %2136 = vmatpush.msra.mxu2 %v5287_v55 }
 0x4b6   :  { %2112 = vmatpush.msra.mxu1 %v5288_v56 }
 0x4b7   :  { %2084 = vmatpush.msra.mxu0 %v5278_v47 }
 0x52b   :  { %v1916_v53 = vpop.f32.mrf.mxu1 }
 0x52d   :  { %v1893_v54 = vpop.f32.mrf.mxu0 }
 0x52e   :  { %v1917_v57 = vadd.f32 %v1916_v53, %v1893_v54  ;;  %v2470_v53 = vld [vmem:[%s4773_s13] sm:$0xff] }
 0x530   :  { %v4606_v58 = vadd.f32 %v1917_v57, %v4583_v49 }
 0x531   :  { %v1938_v59 = vpop.f32.mrf.mxu2 }
 0x532   :  { %v1920_v60 = vmax.f32 %v4606_v58, 0.0  ;;  %v1942_v61 = vrot.slane %v1938_v59, 6 }
 0x534   :  { %v1944_v62 = vadd.f32 %v1942_v61, %v4228_v20  ;;  %2574 = vmatmul.msk.f32.vlgmr.msrb.gmra.mxu3 %vm1142_vm7, %v1920_v60  ;;  %v2435_v61 = vrot.slane %v1920_v60, 7 }
 0x535   :  { %2155 = vmatpush.msrb.mxu3 %v5267_v40 }
 0x536   :  { %v1945_v63 = vmax.f32 %v1944_v62, 0.0 }
 0x537   :  { %2156 = vmatpush.msrb.mxu3 %v5271_v42 }
 0x538   :  { %v1970_v0 = vrot.slane %v1945_v63, 2 }
 0x539   :  { %2157 = vmatpush.msrb.mxu3 %v5275_v44 }
 0x53a   :  { %2575 = vmatmul.msk.f32.vlgmr.msrb.gmra.mxu0 %vm1142_vm7, %v1970_v0  ;;  %2576 = vmatmul.msk.f32.vlgmr.msrb.gmra.mxu1 %vm1142_vm7, %v1970_v0 }
 0x53b   :  { %2158 = vmatpush.msrb.mxu3 %v5278_v47  ;;  %2203 = vmatpush.msrb.mxu1 %v5281_v52 }
 0x53c   :  { %2180 = vmatpush.msrb.mxu0 %v5282_v50 }
 0x53d   :  { %2204 = vmatpush.msrb.mxu1 %v5283_v36 }
 0x53e   :  { %2181 = vmatpush.msrb.mxu0 %v5284_v16 }
 0x53f   :  { %2205 = vmatpush.msrb.mxu1 %v5285_v33 }
 0x540   :  { %2182 = vmatpush.msrb.mxu0 %v5286_v19 }
 0x541   :  { %2206 = vmatpush.msrb.mxu1 %v5287_v55 }
 0x542   :  { %2183 = vmatpush.msrb.mxu0 %v5288_v56 }
 0x5b7   :  { %v1966_v17 = vpop.f32.mrf.mxu3  ;;  %v1990_v48 = vpop.f32.mrf.mxu0 }
 0x5b8   :  { %v1991_v35 = vadd.f32 %v1990_v48, %v1966_v17  ;;  %v2012_v7 = vpop.f32.mrf.mxu1 }
 0x5b9   :  { %v2016_v8 = vrot.slane %v2012_v7, 4 }
 0x5ba   :  { %v4628_v9 = vadd.f32 %v1991_v35, %v4583_v49 }
 0x5bb   :  { %v2018_v6 = vadd.f32 %v2016_v8, %v4228_v20 }
 0x5bc   :  { %v1994_v1 = vmax.f32 %v4628_v9, 0.0 }
 0x5bd   :  { %v2019_v10 = vmax.f32 %v2018_v6, 0.0 }
 0x5be   :  { %2577 = vmatmul.msk.f32.vlgmr.msrb.gmra.mxu2 %vm1142_vm7, %v1994_v1  ;;  %v2437_v63 = vrot.slane %v1994_v1, 6 }
 0x5bf   :  { %v2044_v11 = vrot.slane %v2019_v10, 4  ;;  %2225 = vmatpush.msrb.mxu2 %v5267_v40 }
 0x5c1   :  { %2578 = vmatmul.msk.f32.vlgmr.msra.gmra.mxu3 %vm1142_vm7, %v2044_v11  ;;  %2579 = vmatmul.msk.f32.vlgmr.msra.gmra.mxu0 %vm1142_vm7, %v2044_v11 }
 0x5c2   :  { %2226 = vmatpush.msrb.mxu2 %v5271_v42  ;;  %2253 = vmatpush.msra.mxu3 %v5282_v50 }
 0x5c3   :  { %2277 = vmatpush.msra.mxu0 %v5281_v52 }
 0x5c4   :  { %2227 = vmatpush.msrb.mxu2 %v5275_v44  ;;  %2254 = vmatpush.msra.mxu3 %v5284_v16 }
 0x5c5   :  { %2278 = vmatpush.msra.mxu0 %v5283_v36 }
 0x5c6   :  { %2228 = vmatpush.msrb.mxu2 %v5278_v47  ;;  %2255 = vmatpush.msra.mxu3 %v5286_v19 }
 0x5c7   :  { %2279 = vmatpush.msra.mxu0 %v5285_v33 }
 0x5c8   :  { %2256 = vmatpush.msra.mxu3 %v5288_v56 }
 0x5c9   :  { %2280 = vmatpush.msra.mxu0 %v5287_v55 }
 0x63e   :  { %v2086_v12 = vpop.f32.mrf.mxu0 }
 0x63f   :  { %v2090_v5 = vrot.slane %v2086_v12, 2 }
 0x641   :  { %v2092_v13 = vadd.f32 %v2090_v5, %v4228_v20  ;;  %v2040_v15 = vpop.f32.mrf.mxu2 }
 0x643   :  { %v2093_v14 = vmax.f32 %v2092_v13, 0.0 }
 0x644   :  { %v2064_v21 = vpop.f32.mrf.mxu3 }
 0x645   :  { %v2118_v22 = vrot.slane %v2093_v14, 6  ;;  %v2065_v23 = vadd.f32 %v2064_v21, %v2040_v15 }
 0x647   :  { %v4651_v24 = vadd.f32 %v2065_v23, %v4583_v49  ;;  %2581 = vmatmul.msk.f32.vlgmr.msra.gmra.mxu2 %vm1142_vm7, %v2118_v22  ;;  %2582 = vmatmul.msk.f32.vlgmr.msrb.gmra.mxu3 %vm1142_vm7, %v2118_v22 }
 0x648   :  { %2327 = vmatpush.msra.mxu2 %v5282_v50  ;;  %2351 = vmatpush.msrb.mxu3 %v5281_v52 }
 0x649   :  { %v2068_v2 = vmax.f32 %v4651_v24, 0.0  ;;  %v2607_v24 = vld [vmem:[%s4774_s14] ss:$0 sm:$0xff] }
 0x64a   :  { %2328 = vmatpush.msra.mxu2 %v5284_v16  ;;  %2352 = vmatpush.msrb.mxu3 %v5283_v36 }
 0x64b   :  { %2580 = vmatmul.msk.f32.vlgmr.msra.gmra.mxu1 %vm1142_vm7, %v2068_v2  ;;  %v2439_v48 = vrot.slane %v2068_v2, 5 }
 0x64c   :  { %2299 = vmatpush.msra.mxu1 %v5267_v40  ;;  %2329 = vmatpush.msra.mxu2 %v5286_v19 }
 0x64d   :  { %2353 = vmatpush.msrb.mxu3 %v5285_v33 }
 0x64e   :  { %2300 = vmatpush.msra.mxu1 %v5271_v42  ;;  %2330 = vmatpush.msra.mxu2 %v5288_v56 }
 0x64f   :  { %2354 = vmatpush.msrb.mxu3 %v5287_v55 }
 0x650   :  { %2301 = vmatpush.msra.mxu1 %v5275_v44 }
 0x652   :  { %2302 = vmatpush.msra.mxu1 %v5278_v47 }
 0x6c8   :  { %v2114_v20 = vpop.f32.mrf.mxu1 }
 0x6ca   :  { %v2138_v34 = vpop.f32.mrf.mxu2  ;;  %v2160_v25 = vpop.f32.mrf.mxu3 }
 0x6cb   :  { %v2139_v26 = vadd.f32 %v2138_v34, %v2114_v20  ;;  %v2163_v27 = vadd.f32 %v2160_v25, %v4231_v51 }
 0x6cd   :  { %v4673_v28 = vadd.f32 %v2139_v26, %v4583_v49  ;;  %v2164_v29 = vmax.f32 %v2163_v27, 0.0 }
 0x6cf   :  { %v2142_v30 = vmax.f32 %v4673_v28, 0.0  ;;  %2584 = vmatmul.msk.f32.vlgmr.msrb.gmra.mxu1 %vm1142_vm7, %v2164_v29  ;;  %2585 = vmatmul.msk.f32.vlgmr.msrb.gmra.mxu2 %vm1142_vm7, %v2164_v29 }
 0x6d0   :  { %2425 = vmatpush.msrb.mxu2 %v5281_v52  ;;  %2401 = vmatpush.msrb.mxu1 %v5282_v50 }
 0x6d1   :  { %2583 = vmatmul.msk.f32.vlgmr.msrb.gmra.mxu0 %vm1142_vm7, %v2142_v30  ;;  %v2441_v8 = vrot.slane %v2142_v30, 4 }
 0x6d2   :  { %2373 = vmatpush.msrb.mxu0 %v5267_v40  ;;  %2426 = vmatpush.msrb.mxu2 %v5283_v36 }
 0x6d3   :  { %2402 = vmatpush.msrb.mxu1 %v5284_v16 }
 0x6d4   :  { %2374 = vmatpush.msrb.mxu0 %v5271_v42  ;;  %2427 = vmatpush.msrb.mxu2 %v5285_v33 }
 0x6d5   :  { %2403 = vmatpush.msrb.mxu1 %v5286_v19 }
 0x6d6   :  { %2375 = vmatpush.msrb.mxu0 %v5275_v44  ;;  %2428 = vmatpush.msrb.mxu2 %v5287_v55 }
 0x6d7   :  { %2404 = vmatpush.msrb.mxu1 %v5288_v56 }
 0x6d8   :  { %2376 = vmatpush.msrb.mxu0 %v5278_v47 }
 0x74c   :  { %v2208_v52 = vpop.f32.mrf.mxu1 }
 0x74e   :  { %v2185_v40 = vpop.f32.mrf.mxu0 }
 0x74f   :  { %v2209_v50 = vadd.f32 %v2208_v52, %v2185_v40 }
 0x751   :  { %v2211_v36 = vadd.f32 %v2209_v50, %v4583_v49 }
 0x752   :  { %v2230_v16 = vpop.f32.mrf.mxu2 }
 0x753   :  { %v2212_v31 = vmax.f32 %v2211_v36, 0.0  ;;  %v2234_v42 = vrot.slane %v2230_v16, 6 }
 0x755   :  { %v2236_v33 = vadd.f32 %v2234_v42, %v4231_v51  ;;  %2586 = vmatmul.msk.f32.vlgmr.msra.gmra.mxu3 %vm1142_vm7, %v2212_v31  ;;  %v2443_v58 = vrot.slane %v2212_v31, 3 }
 0x756   :  { %2499 = vmatpush.msra.mxu3 %v2473_v4 }
 0x757   :  { %v2237_v19 = vmax.f32 %v2236_v33, 0.0 }
 0x758   :  { %2500 = vmatpush.msra.mxu3 %v2472_v43 }
 0x759   :  { %v2262_v44 = vrot.slane %v2237_v19, 2 }
 0x75a   :  { %2501 = vmatpush.msra.mxu3 %v2471_v45 }
 0x75b   :  { %2587 = vmatmul.msk.f32.vlgmr.msra.gmra.mxu0 %vm1142_vm7, %v2262_v44  ;;  %2588 = vmatmul.msk.f32.vlgmr.msra.gmra.mxu1 %vm1142_vm7, %v2262_v44 }
 0x75c   :  { %2502 = vmatpush.msra.mxu3 %v2470_v53 }
 0x7d8   :  { %v2258_v55 = vpop.f32.mrf.mxu3  ;;  %v2282_v47 = vpop.f32.mrf.mxu0 }
 0x7d9   :  { %v2283_v56 = vadd.f32 %v2282_v47, %v2258_v55  ;;  %v2304_v37 = vpop.f32.mrf.mxu1 }
 0x7da   :  { %v2308_v38 = vrot.slane %v2304_v37, 4 }
 0x7db   :  { %v2285_v18 = vadd.f32 %v2283_v56, %v4583_v49 }
 0x7dc   :  { %v2310_v39 = vadd.f32 %v2308_v38, %v4231_v51 }
 0x7dd   :  { %v2286_v3 = vmax.f32 %v2285_v18, 0.0 }
 0x7de   :  { %v2311_v41 = vmax.f32 %v2310_v39, 0.0 }
 0x7df   :  { %2589 = vmatmul.msk.f32.vlgmr.msra.gmra.mxu2 %vm1142_vm7, %v2286_v3  ;;  %v2445_v6 = vrot.slane %v2286_v3, 2 }
 0x7e0   :  { %v2336_v32 = vrot.slane %v2311_v41, 4 }
 0x7e2   :  { %2590 = vmatmul.msk.f32.vlgmr.msrb.gmra.mxu3 %vm1142_vm7, %v2336_v32  ;;  %2591 = vmatmul.msk.f32.vlgmr.msrb.gmra.mxu0 %vm1142_vm7, %v2336_v32 }
 0x85f   :  { %v2378_v54 = vpop.f32.mrf.mxu0 }
 0x860   :  { %v2382_v57 = vrot.slane %v2378_v54, 2 }
 0x862   :  { %v2384_v59 = vadd.f32 %v2382_v57, %v4231_v51  ;;  %v2332_v0 = vpop.f32.mrf.mxu2  ;;  %v2450_v51 = vsel %vm2449_vm8, %v4587_v46, %v2435_v61 }
 0x863   :  { %v2452_v9 = vsel %vm2451_vm9, %v2450_v51, %v2437_v63 }
 0x864   :  { %v2385_v62 = vmax.f32 %v2384_v59, 0.0  ;;  %v2454_v1 = vsel %vm2453_vm10, %v2452_v9, %v2439_v48 }
 0x865   :  { %v2356_v17 = vpop.f32.mrf.mxu3  ;;  %v2455_v11 = vsel %vm591_vm0, %v2454_v1, %v2441_v8 }
 0x866   :  { %v2410_v35 = vrot.slane %v2385_v62, 6  ;;  %v2357_v7 = vadd.f32 %v2356_v17, %v2332_v0  ;;  %v2457_v5 = vsel %vm2456_vm11, %v2455_v11, %v2443_v58 }
 0x867   :  { %v2459_v13 = vsel %vm2458_vm12, %v2457_v5, %v2445_v6 }
 0x868   :  { %v2359_v60 = vadd.f32 %v2357_v7, %v4583_v49  ;;  %2593 = vmatmul.msk.f32.vlgmr.msrb.gmra.mxu2 %vm1142_vm7, %v2410_v35 }
 0x86a   :  { %v2360_v10 = vmax.f32 %v2359_v60, 0.0 }
 0x86c   :  { %v2447_v12 = vrot.slane %v2360_v10, 1  ;;  %2592 = vmatmul.msk.f32.vlgmr.msrb.gmra.mxu1 %vm1142_vm7, %v2360_v10 }
 0x86e   :  { %v2461_v14 = vsel %vm2460_vm13, %v2459_v13, %v2447_v12 }
 0x86f   :  { %2594 = vmatmul.msk.f32.vlgmr.msra.gmra.mxu3 %vm1142_vm7, %v2461_v14 }
 0x8e9   :  { %v2406_v15 = vpop.f32.mrf.mxu1 }
 0x8eb   :  { %v2430_v21 = vpop.f32.mrf.mxu2 }
 0x8ec   :  { %v2431_v22 = vadd.f32 %v2430_v21, %v2406_v15 }
 0x8ee   :  { %v2433_v23 = vadd.f32 %v2431_v22, %v4583_v49 }
 0x8f0   :  { %v2434_v2 = vmax.f32 %v2433_v23, 0.0 }
 0x8f2   :  { %v2462_v20 = vsel %vm2449_vm8, %v2434_v2, %v4587_v46  ;;  %v2504_v34 = vpop.f32.mrf.mxu3  ;;  %v2469_v46 = vsel %vm2449_vm8, %v2447_v12, %v2434_v2 }
 0x8f3   :  { %v2463_v25 = vsel %vm2451_vm9, %v2462_v20, %v2435_v61  ;;  %v2505_v26 = vadd.f32 %v2607_v24, %v2504_v34 }
 0x8f4   :  { %v2464_v27 = vsel %vm2453_vm10, %v2463_v25, %v2437_v63 }
 0x8f5   :  { %2513 = vst [vmem:[%s4775_s15] sm:$0xff] %v2505_v26  ;;  %v2465_v49 = vsel %vm591_vm0, %v2464_v27, %v2439_v48 }
 0x8f6   :  { %v2466_v28 = vsel %vm2456_vm11, %v2465_v49, %v2441_v8 }
 0x8f7   :  { %v2467_v29 = vsel %vm2458_vm12, %v2466_v28, %v2443_v58 }
 0x8f8   :  { %v2468_v30 = vsel %vm2460_vm13, %v2467_v29, %v2445_v6 }
 0x8f9   :  { %2595 = vmatmul.msk.f32.gmra.mxu3 %vm1142_vm7, %v2468_v30 }
 0x901   :  { %2596 = vmatmul.msk.f32.gmra.mxu3 %vm1142_vm7, %v2469_v46 }
 0x97c   :  { %v2507_v52 = vpop.f32.mrf.mxu3 }
 0x97d   :  { %v2508_v40 = vadd.f32 %v2607_v24, %v2507_v52 }
 0x97f   :  { %2514 = vst [vmem:[%s4775_s15 + $0x8] sm:$0xff] %v2508_v40 }
 0x984   :  { %v2510_v50 = vpop.f32.mrf.mxu3 }
 0x985   :  { %v2511_v36 = vadd.f32 %v2607_v24, %v2510_v50 }
 0x987   :  { %2515 = vst [vmem:[%s4775_s15 + $0x10] sm:$0x3] %v2511_v36 }
 0x988   :  { %2520 = vsyncmov [#allocation3] }
 0x98b   :  { %s2521_s8 = vpop.sfrf %2520 }
 0x98c   :  { %p2597_p0 = scmp.ne.s32.totalorder %s2521_s8, 0 }
 0x98e   :  { %2525 = shalt.err (%p2597_p0)  }

</bundles_post_ra>
